<compile_context>
chip_gen: v5e
topology: v5e:2x2
jax: 0.10.0
libtpu: 0.0.40
codegen_flags: <defaults>
</compile_context>

<pallas_src>
import jax
import jax.numpy as jnp
from jax.experimental import pallas as pl
from jax.experimental.pallas import tpu as pltpu

# ----------------------------- tiny BERT config -----------------------------
B = 2            # batch
S = 8            # sequence length
H = 32           # hidden size
NH = 4           # attention heads
DH = H // NH     # head dim
FF = 64          # intermediate (FFN) size
VOCAB = 100
TYPE_VOCAB = 2
MAX_POS = 32
N_LAYERS = 2
EPS = 1e-12      # BERT LayerNorm eps
SCALE = 1.0 / float(DH) ** 0.5


# ------------------------------ helpers (traced) -----------------------------
def _layer_norm(x, g, b):
    mu = jnp.mean(x, axis=-1, keepdims=True)
    var = jnp.mean((x - mu) ** 2, axis=-1, keepdims=True)
    return (x - mu) * jax.lax.rsqrt(var + EPS) * g + b


def _gelu(x):
    # tanh-approximation GELU (EUP-friendly).
    return 0.5 * x * (1.0 + jnp.tanh(0.7978845608028654 * (x + 0.044715 * x * x * x)))


def _bf16(x):
    return x.astype(jnp.bfloat16)


# ------------------------------ fused kernel ---------------------------------
def fused_bert_kernel(x_ref, am_ref, eg_ref, eb_ref,
                      wq_ref, bq_ref, wk_ref, bk_ref, wv_ref, bv_ref,
                      wo_ref, bo_ref, g1_ref, be1_ref,
                      w1_ref, bf1_ref, w2_ref, bf2_ref, g2_ref, be2_ref,
                      wp_ref, bp_ref,
                      seq_ref, pool_ref):
    # One batch element per grid step: activations are a (S, H) slab.
    x = _layer_norm(x_ref[0], eg_ref[...], eb_ref[...])            # (S, H) f32
    add_mask = (1.0 - am_ref[0]) * -10000.0                        # (1, S) over keys

    for l in range(N_LAYERS):            # static unroll; stacked weights stay in VMEM
        # heads on the leading (batch) einsum axis -> no lane slicing / concat.
        xb = jnp.broadcast_to(_bf16(x)[None], (NH, S, H))           # (NH, S, H) bf16
        q = jnp.einsum('nsh,nhd->nsd', xb, wq_ref[l],
                       preferred_element_type=jnp.float32) + bq_ref[l]   # (NH, S, DH)
        k = jnp.einsum('nsh,nhd->nsd', xb, wk_ref[l],
                       preferred_element_type=jnp.float32) + bk_ref[l]
        v = jnp.einsum('nsh,nhd->nsd', xb, wv_ref[l],
                       preferred_element_type=jnp.float32) + bv_ref[l]
        q = q * SCALE                                               # scale folded once

        s = jnp.einsum('nqd,nkd->nqk', _bf16(q), _bf16(k),
                       preferred_element_type=jnp.float32)          # (NH, S, S)
        s = s + add_mask                                            # pad mask (keys)
        s = s - jnp.max(s, axis=-1, keepdims=True)
        p = jnp.exp(s)
        p = p * pl.reciprocal(jnp.sum(p, axis=-1, keepdims=True), approx=True)

        ctx = jnp.einsum('nqk,nkd->nqd', _bf16(p), _bf16(v),
                         preferred_element_type=jnp.float32)        # (NH, S, DH)
        # output projection: batched per-head matmul + head reduction (no concat).
        attn = jnp.sum(jnp.einsum('nsd,ndh->nsh', _bf16(ctx), wo_ref[l],
                                  preferred_element_type=jnp.float32),
                       axis=0) + bo_ref[l]                          # (S, H)
        x1 = _layer_norm(x + attn, g1_ref[l], be1_ref[l])

        h1 = _gelu(jnp.dot(_bf16(x1), w1_ref[l],
                           preferred_element_type=jnp.float32) + bf1_ref[l])
        ff = jnp.dot(_bf16(h1), w2_ref[l],
                     preferred_element_type=jnp.float32) + bf2_ref[l]
        x = _layer_norm(x1 + ff, g2_ref[l], be2_ref[l])

    seq_ref[...] = x[None]                                          # (1, S, H)

    # pooler: tanh(W @ h_[CLS] + b); [CLS] is row 0 of this batch element.
    x_cls = x[0:1, :]                                               # (1, H)
    pooled = jnp.tanh(jnp.dot(_bf16(x_cls), wp_ref[...],
                              preferred_element_type=jnp.float32) + bp_ref[...])
    pool_ref[...] = pooled[None]                                    # (1, 1, H)


def _resident_spec(shape):
    # Full-array block with a constant index map: DMA'd once, VMEM-resident
    # across the batch grid (blocked specs default to VMEM on TPU).
    zeros = (0,) * len(shape)
    return pl.BlockSpec(shape, lambda b, _z=zeros: _z)


def fused_bert_forward(emb, amask3, params):
    grid_spec = pltpu.PrefetchScalarGridSpec(
        num_scalar_prefetch=0,
        grid=(B,),
        in_specs=[
            pl.BlockSpec((1, S, H), lambda b: (b, 0, 0)),      # summed embeddings
            pl.BlockSpec((1, 1, S), lambda b: (b, 0, 0)),      # pad mask (float)
            _resident_spec((1, H)), _resident_spec((1, H)),    # embedding LN g, b
            _resident_spec((N_LAYERS, NH, H, DH)), _resident_spec((N_LAYERS, NH, 1, DH)),  # wq,bq
            _resident_spec((N_LAYERS, NH, H, DH)), _resident_spec((N_LAYERS, NH, 1, DH)),  # wk,bk
            _resident_spec((N_LAYERS, NH, H, DH)), _resident_spec((N_LAYERS, NH, 1, DH)),  # wv,bv
            _resident_spec((N_LAYERS, NH, DH, H)), _resident_spec((N_LAYERS, 1, H)),       # wo,bo
            _resident_spec((N_LAYERS, 1, H)), _resident_spec((N_LAYERS, 1, H)),            # g1,be1
            _resident_spec((N_LAYERS, H, FF)), _resident_spec((N_LAYERS, 1, FF)),          # w1,bf1
            _resident_spec((N_LAYERS, FF, H)), _resident_spec((N_LAYERS, 1, H)),           # w2,bf2
            _resident_spec((N_LAYERS, 1, H)), _resident_spec((N_LAYERS, 1, H)),            # g2,be2
            _resident_spec((H, H)), _resident_spec((1, H)),                                # pooler
        ],
        out_specs=[
            pl.BlockSpec((1, S, H), lambda b: (b, 0, 0)),
            pl.BlockSpec((1, 1, H), lambda b: (b, 0, 0)),
        ],
    )
    return pl.pallas_call(
        fused_bert_kernel,
        grid_spec=grid_spec,
        out_shape=(jax.ShapeDtypeStruct((B, S, H), jnp.float32),
                   jax.ShapeDtypeStruct((B, 1, H), jnp.float32)),
        compiler_params=pltpu.CompilerParams(
            dimension_semantics=("parallel",),      # v7x: one batch element per TC
            vmem_limit_bytes=32 * 1024 * 1024),     # safe on v5e/v6e/v7x, >> toy need
    )(emb, amask3,
      params["emb_ln_g"], params["emb_ln_b"],
      params["wq"], params["bq"], params["wk"], params["bk"],
      params["wv"], params["bv"], params["wo"], params["bo"],
      params["g1"], params["be1"],
      params["w1"], params["bf1"], params["w2"], params["bf2"],
      params["g2"], params["be2"],
      params["pool_w"], params["pool_b"])


# ------------------------------- full forward ---------------------------------
def init_params(key):
    def nrm(k, shape, dtype=jnp.bfloat16, scale=0.02):
        return (scale * jax.random.normal(k, shape, jnp.float32)).astype(dtype)

    def zeros(shape):
        return jnp.zeros(shape, jnp.float32)

    keys = iter(jax.random.split(key, 32))
    # Per-layer weights stacked along N_LAYERS; attention weights carry an
    # explicit head axis so the kernel never slices the lane dimension.
    # TODO(synk): when importing a torch checkpoint, transpose nn.Linear weights
    #             ((out,in) -> (in,out)) and split the head axis accordingly.
    p = {
        "word_emb": nrm(next(keys), (VOCAB, H), jnp.float32),
        "tok_emb": nrm(next(keys), (TYPE_VOCAB, H), jnp.float32),
        "pos_emb": nrm(next(keys), (MAX_POS, H), jnp.float32),
        "pos_emb2": nrm(next(keys), (MAX_POS, H), jnp.float32),
        "emb_ln_g": jnp.ones((1, H), jnp.float32), "emb_ln_b": zeros((1, H)),
        "wq": nrm(next(keys), (N_LAYERS, NH, H, DH)), "bq": zeros((N_LAYERS, NH, 1, DH)),
        "wk": nrm(next(keys), (N_LAYERS, NH, H, DH)), "bk": zeros((N_LAYERS, NH, 1, DH)),
        "wv": nrm(next(keys), (N_LAYERS, NH, H, DH)), "bv": zeros((N_LAYERS, NH, 1, DH)),
        "wo": nrm(next(keys), (N_LAYERS, NH, DH, H)), "bo": zeros((N_LAYERS, 1, H)),
        "g1": jnp.ones((N_LAYERS, 1, H), jnp.float32), "be1": zeros((N_LAYERS, 1, H)),
        "w1": nrm(next(keys), (N_LAYERS, H, FF)), "bf1": zeros((N_LAYERS, 1, FF)),
        "w2": nrm(next(keys), (N_LAYERS, FF, H)), "bf2": zeros((N_LAYERS, 1, H)),
        "g2": jnp.ones((N_LAYERS, 1, H), jnp.float32), "be2": zeros((N_LAYERS, 1, H)),
        "pool_w": nrm(next(keys), (H, H)), "pool_b": zeros((1, H)),
    }
    return p


def bert_embedding_layer_forward(params, input_ids, token_type_ids,
                                 attention_mask, position_ids, position_ids_second):
    # Embedding gathers + sum stay in plain JAX (XLA fuses the adds into the gathers).
    emb = (jnp.take(params["word_emb"], input_ids, axis=0)
           + jnp.take(params["tok_emb"], token_type_ids, axis=0)
           + jnp.take(params["pos_emb"], position_ids, axis=0)
           + jnp.take(params["pos_emb2"], position_ids_second, axis=0))      # (B, S, H)
    amask3 = attention_mask.astype(jnp.float32).reshape(B, 1, S)             # tiny pad mask

    seq, pooled = fused_bert_forward(emb, amask3, params)
    # matches bertEmbeddingLayer.forward return: (sequence_output, pooled_output)
    return seq, pooled.reshape(B, H)


# ----------------------------------- main -------------------------------------
if __name__ == "__main__":
    key = jax.random.PRNGKey(0)
    pkey, ikey = jax.random.split(key)
    params = init_params(pkey)

    ins_input_ids = jax.random.randint(ikey, (B, S), 0, VOCAB, dtype=jnp.int32)
    ins_token_type_ids = jnp.zeros((B, S), jnp.int32)
    ins_attention_mask = jnp.ones((B, S), jnp.int32)
    ins_position_ids = jnp.broadcast_to(jnp.arange(S, dtype=jnp.int32), (B, S))
    ins_position_ids_second = jnp.broadcast_to(jnp.arange(S, dtype=jnp.int32), (B, S))

    fwd = jax.jit(bert_embedding_layer_forward)
    seq_out, pooled_out = fwd(params, ins_input_ids, ins_token_type_ids,
                              ins_attention_mask, ins_position_ids,
                              ins_position_ids_second)

    jax.block_until_ready((seq_out, pooled_out))
    assert seq_out.shape == (B, S, H) and pooled_out.shape == (B, H)
    print("KERNEL_OK")
</pallas_src>

<mosaic_0001>
module attributes {stable_mosaic.version = 11 : i64} {
  func.func @fused_bert_kernel(%arg0: i32, %arg1: memref<1x8x32xf32, #tpu.memory_space<vmem>>, %arg2: memref<1x1x8xf32, #tpu.memory_space<vmem>>, %arg3: memref<1x32xf32, #tpu.memory_space<vmem>>, %arg4: memref<1x32xf32, #tpu.memory_space<vmem>>, %arg5: memref<2x4x32x8xbf16, #tpu.memory_space<vmem>>, %arg6: memref<2x4x1x8xf32, #tpu.memory_space<vmem>>, %arg7: memref<2x4x32x8xbf16, #tpu.memory_space<vmem>>, %arg8: memref<2x4x1x8xf32, #tpu.memory_space<vmem>>, %arg9: memref<2x4x32x8xbf16, #tpu.memory_space<vmem>>, %arg10: memref<2x4x1x8xf32, #tpu.memory_space<vmem>>, %arg11: memref<2x4x8x32xbf16, #tpu.memory_space<vmem>>, %arg12: memref<2x1x32xf32, #tpu.memory_space<vmem>>, %arg13: memref<2x1x32xf32, #tpu.memory_space<vmem>>, %arg14: memref<2x1x32xf32, #tpu.memory_space<vmem>>, %arg15: memref<2x32x64xbf16, #tpu.memory_space<vmem>>, %arg16: memref<2x1x64xf32, #tpu.memory_space<vmem>>, %arg17: memref<2x64x32xbf16, #tpu.memory_space<vmem>>, %arg18: memref<2x1x32xf32, #tpu.memory_space<vmem>>, %arg19: memref<2x1x32xf32, #tpu.memory_space<vmem>>, %arg20: memref<2x1x32xf32, #tpu.memory_space<vmem>>, %arg21: memref<32x32xbf16, #tpu.memory_space<vmem>>, %arg22: memref<1x32xf32, #tpu.memory_space<vmem>>, %arg23: memref<1x8x32xf32, #tpu.memory_space<vmem>>, %arg24: memref<1x1x32xf32, #tpu.memory_space<vmem>>) attributes {dimension_semantics = [#tpu.dimension_semantics<parallel>], iteration_bounds = array<i64: 2>, scalar_prefetch = 0 : i64, scratch_operands = 0 : i64, tpu.core_type = #tpu.core_type<tc>, window_params = [{transform_indices = @transform_0, window_bounds = array<i64: 1, 8, 32>}, {transform_indices = @transform_1, window_bounds = array<i64: 1, 1, 8>}, {pipeline_mode = #tpu.pipeline_mode<synchronous>, transform_indices = @transform_2, window_bounds = array<i64: 1, 32>}, {pipeline_mode = #tpu.pipeline_mode<synchronous>, transform_indices = @transform_3, window_bounds = array<i64: 1, 32>}, {pipeline_mode = #tpu.pipeline_mode<synchronous>, transform_indices = @transform_4, window_bounds = array<i64: 2, 4, 32, 8>}, {pipeline_mode = #tpu.pipeline_mode<synchronous>, transform_indices = @transform_5, window_bounds = array<i64: 2, 4, 1, 8>}, {pipeline_mode = #tpu.pipeline_mode<synchronous>, transform_indices = @transform_6, window_bounds = array<i64: 2, 4, 32, 8>}, {pipeline_mode = #tpu.pipeline_mode<synchronous>, transform_indices = @transform_7, window_bounds = array<i64: 2, 4, 1, 8>}, {pipeline_mode = #tpu.pipeline_mode<synchronous>, transform_indices = @transform_8, window_bounds = array<i64: 2, 4, 32, 8>}, {pipeline_mode = #tpu.pipeline_mode<synchronous>, transform_indices = @transform_9, window_bounds = array<i64: 2, 4, 1, 8>}, {pipeline_mode = #tpu.pipeline_mode<synchronous>, transform_indices = @transform_10, window_bounds = array<i64: 2, 4, 8, 32>}, {pipeline_mode = #tpu.pipeline_mode<synchronous>, transform_indices = @transform_11, window_bounds = array<i64: 2, 1, 32>}, {pipeline_mode = #tpu.pipeline_mode<synchronous>, transform_indices = @transform_12, window_bounds = array<i64: 2, 1, 32>}, {pipeline_mode = #tpu.pipeline_mode<synchronous>, transform_indices = @transform_13, window_bounds = array<i64: 2, 1, 32>}, {pipeline_mode = #tpu.pipeline_mode<synchronous>, transform_indices = @transform_14, window_bounds = array<i64: 2, 32, 64>}, {pipeline_mode = #tpu.pipeline_mode<synchronous>, transform_indices = @transform_15, window_bounds = array<i64: 2, 1, 64>}, {pipeline_mode = #tpu.pipeline_mode<synchronous>, transform_indices = @transform_16, window_bounds = array<i64: 2, 64, 32>}, {pipeline_mode = #tpu.pipeline_mode<synchronous>, transform_indices = @transform_17, window_bounds = array<i64: 2, 1, 32>}, {pipeline_mode = #tpu.pipeline_mode<synchronous>, transform_indices = @transform_18, window_bounds = array<i64: 2, 1, 32>}, {pipeline_mode = #tpu.pipeline_mode<synchronous>, transform_indices = @transform_19, window_bounds = array<i64: 2, 1, 32>}, {pipeline_mode = #tpu.pipeline_mode<synchronous>, transform_indices = @transform_20, window_bounds = array<i64: 32, 32>}, {pipeline_mode = #tpu.pipeline_mode<synchronous>, transform_indices = @transform_21, window_bounds = array<i64: 1, 32>}, {transform_indices = @transform_22, window_bounds = array<i64: 1, 8, 32>}, {transform_indices = @transform_23, window_bounds = array<i64: 1, 1, 32>}]} {
    %c0 = arith.constant 0 : index
    %c0_0 = arith.constant 0 : index
    %c0_1 = arith.constant 0 : index
    %0 = vector.load %arg1[%c0, %c0_0, %c0_1] : memref<1x8x32xf32, #tpu.memory_space<vmem>>, vector<1x8x32xf32>
    %1 = vector.shape_cast %0 : vector<1x8x32xf32> to vector<8x32xf32>
    %c0_2 = arith.constant 0 : index
    %c0_3 = arith.constant 0 : index
    %2 = vector.load %arg3[%c0_2, %c0_3] : memref<1x32xf32, #tpu.memory_space<vmem>>, vector<1x32xf32>
    %c0_4 = arith.constant 0 : index
    %c0_5 = arith.constant 0 : index
    %3 = vector.load %arg4[%c0_4, %c0_5] : memref<1x32xf32, #tpu.memory_space<vmem>>, vector<1x32xf32>
    %cst = arith.constant dense<0.000000e+00> : vector<8xf32>
    %4 = vector.multi_reduction <add>, %1, %cst [1] : vector<8x32xf32> to vector<8xf32>
    %5 = vector.shape_cast %4 : vector<8xf32> to vector<8x1xf32>
    %cst_6 = arith.constant 3.200000e+01 : f32
    %6 = vector.broadcast %cst_6 : f32 to vector<8x1xf32>
    %7 = arith.divf %5, %6 : vector<8x1xf32>
    %8 = vector.broadcast %7 : vector<8x1xf32> to vector<8x32xf32>
    %9 = arith.subf %1, %8 : vector<8x32xf32>
    %10 = arith.mulf %9, %9 : vector<8x32xf32>
    %cst_7 = arith.constant dense<0.000000e+00> : vector<8xf32>
    %11 = vector.multi_reduction <add>, %10, %cst_7 [1] : vector<8x32xf32> to vector<8xf32>
    %12 = vector.shape_cast %11 : vector<8xf32> to vector<8x1xf32>
    %cst_8 = arith.constant 3.200000e+01 : f32
    %13 = vector.broadcast %cst_8 : f32 to vector<8x1xf32>
    %14 = arith.divf %12, %13 : vector<8x1xf32>
    %15 = vector.broadcast %7 : vector<8x1xf32> to vector<8x32xf32>
    %16 = arith.subf %1, %15 : vector<8x32xf32>
    %cst_9 = arith.constant 9.99999996E-13 : f32
    %17 = vector.broadcast %cst_9 : f32 to vector<8x1xf32>
    %18 = arith.addf %14, %17 : vector<8x1xf32>
    %19 = math.rsqrt %18 : vector<8x1xf32>
    %20 = vector.broadcast %19 : vector<8x1xf32> to vector<8x32xf32>
    %21 = arith.mulf %16, %20 : vector<8x32xf32>
    %22 = vector.broadcast %2 : vector<1x32xf32> to vector<8x32xf32>
    %23 = arith.mulf %21, %22 : vector<8x32xf32>
    %24 = vector.broadcast %3 : vector<1x32xf32> to vector<8x32xf32>
    %25 = arith.addf %23, %24 : vector<8x32xf32>
    %c0_10 = arith.constant 0 : index
    %c0_11 = arith.constant 0 : index
    %c0_12 = arith.constant 0 : index
    %26 = vector.load %arg2[%c0_10, %c0_11, %c0_12] : memref<1x1x8xf32, #tpu.memory_space<vmem>>, vector<1x1x8xf32>
    %27 = vector.shape_cast %26 : vector<1x1x8xf32> to vector<1x8xf32>
    %cst_13 = arith.constant 1.000000e+00 : f32
    %28 = vector.broadcast %cst_13 : f32 to vector<1x8xf32>
    %29 = arith.subf %28, %27 : vector<1x8xf32>
    %cst_14 = arith.constant -1.000000e+04 : f32
    %30 = vector.broadcast %cst_14 : f32 to vector<1x8xf32>
    %31 = arith.mulf %29, %30 : vector<1x8xf32>
    %32 = arith.truncf %25 : vector<8x32xf32> to vector<8x32xbf16>
    %33 = vector.shape_cast %32 : vector<8x32xbf16> to vector<1x8x32xbf16>
    %34 = vector.shape_cast %33 : vector<1x8x32xbf16> to vector<1x8x32xbf16>
    %35 = vector.broadcast %34 : vector<1x8x32xbf16> to vector<4x8x32xbf16>
    %c0_15 = arith.constant 0 : index
    %c0_16 = arith.constant 0 : index
    %c0_17 = arith.constant 0 : index
    %c0_18 = arith.constant 0 : index
    %36 = vector.load %arg5[%c0_15, %c0_16, %c0_17, %c0_18] : memref<2x4x32x8xbf16, #tpu.memory_space<vmem>>, vector<1x4x32x8xbf16>
    %37 = vector.shape_cast %36 : vector<1x4x32x8xbf16> to vector<4x32x8xbf16>
    "tpu.trace_start"() <{level = 10 : i32, message = "nsh,nhd->nsd"}> : () -> ()
    %cst_19 = arith.constant dense<0.000000e+00> : vector<4x8x8xf32>
    %38 = tpu.matmul %35, %37, %cst_19 {dimension_numbers = #tpu.dot_dimension_numbers<[2], [1], [1], [2], [0, 0, 0, 1, 1, 2], [0], [0]>} : vector<4x8x32xbf16>, vector<4x32x8xbf16>, vector<4x8x8xf32> -> vector<4x8x8xf32>
    "tpu.trace_stop"() : () -> ()
    %c0_20 = arith.constant 0 : index
    %c0_21 = arith.constant 0 : index
    %c0_22 = arith.constant 0 : index
    %c0_23 = arith.constant 0 : index
    %39 = vector.load %arg6[%c0_20, %c0_21, %c0_22, %c0_23] : memref<2x4x1x8xf32, #tpu.memory_space<vmem>>, vector<1x4x1x8xf32>
    %40 = vector.shape_cast %39 : vector<1x4x1x8xf32> to vector<4x1x8xf32>
    %41 = vector.broadcast %40 : vector<4x1x8xf32> to vector<4x8x8xf32>
    %42 = arith.addf %38, %41 : vector<4x8x8xf32>
    %c0_24 = arith.constant 0 : index
    %c0_25 = arith.constant 0 : index
    %c0_26 = arith.constant 0 : index
    %c0_27 = arith.constant 0 : index
    %43 = vector.load %arg7[%c0_24, %c0_25, %c0_26, %c0_27] : memref<2x4x32x8xbf16, #tpu.memory_space<vmem>>, vector<1x4x32x8xbf16>
    %44 = vector.shape_cast %43 : vector<1x4x32x8xbf16> to vector<4x32x8xbf16>
    "tpu.trace_start"() <{level = 10 : i32, message = "nsh,nhd->nsd"}> : () -> ()
    %cst_28 = arith.constant dense<0.000000e+00> : vector<4x8x8xf32>
    %45 = tpu.matmul %35, %44, %cst_28 {dimension_numbers = #tpu.dot_dimension_numbers<[2], [1], [1], [2], [0, 0, 0, 1, 1, 2], [0], [0]>} : vector<4x8x32xbf16>, vector<4x32x8xbf16>, vector<4x8x8xf32> -> vector<4x8x8xf32>
    "tpu.trace_stop"() : () -> ()
    %c0_29 = arith.constant 0 : index
    %c0_30 = arith.constant 0 : index
    %c0_31 = arith.constant 0 : index
    %c0_32 = arith.constant 0 : index
    %46 = vector.load %arg8[%c0_29, %c0_30, %c0_31, %c0_32] : memref<2x4x1x8xf32, #tpu.memory_space<vmem>>, vector<1x4x1x8xf32>
    %47 = vector.shape_cast %46 : vector<1x4x1x8xf32> to vector<4x1x8xf32>
    %48 = vector.broadcast %47 : vector<4x1x8xf32> to vector<4x8x8xf32>
    %49 = arith.addf %45, %48 : vector<4x8x8xf32>
    %c0_33 = arith.constant 0 : index
    %c0_34 = arith.constant 0 : index
    %c0_35 = arith.constant 0 : index
    %c0_36 = arith.constant 0 : index
    %50 = vector.load %arg9[%c0_33, %c0_34, %c0_35, %c0_36] : memref<2x4x32x8xbf16, #tpu.memory_space<vmem>>, vector<1x4x32x8xbf16>
    %51 = vector.shape_cast %50 : vector<1x4x32x8xbf16> to vector<4x32x8xbf16>
    "tpu.trace_start"() <{level = 10 : i32, message = "nsh,nhd->nsd"}> : () -> ()
    %cst_37 = arith.constant dense<0.000000e+00> : vector<4x8x8xf32>
    %52 = tpu.matmul %35, %51, %cst_37 {dimension_numbers = #tpu.dot_dimension_numbers<[2], [1], [1], [2], [0, 0, 0, 1, 1, 2], [0], [0]>} : vector<4x8x32xbf16>, vector<4x32x8xbf16>, vector<4x8x8xf32> -> vector<4x8x8xf32>
    "tpu.trace_stop"() : () -> ()
    %c0_38 = arith.constant 0 : index
    %c0_39 = arith.constant 0 : index
    %c0_40 = arith.constant 0 : index
    %c0_41 = arith.constant 0 : index
    %53 = vector.load %arg10[%c0_38, %c0_39, %c0_40, %c0_41] : memref<2x4x1x8xf32, #tpu.memory_space<vmem>>, vector<1x4x1x8xf32>
    %54 = vector.shape_cast %53 : vector<1x4x1x8xf32> to vector<4x1x8xf32>
    %55 = vector.broadcast %54 : vector<4x1x8xf32> to vector<4x8x8xf32>
    %56 = arith.addf %52, %55 : vector<4x8x8xf32>
    %cst_42 = arith.constant 0.353553385 : f32
    %57 = vector.broadcast %cst_42 : f32 to vector<4x8x8xf32>
    %58 = arith.mulf %42, %57 : vector<4x8x8xf32>
    %59 = arith.truncf %58 : vector<4x8x8xf32> to vector<4x8x8xbf16>
    %60 = arith.truncf %49 : vector<4x8x8xf32> to vector<4x8x8xbf16>
    "tpu.trace_start"() <{level = 10 : i32, message = "nqd,nkd->nqk"}> : () -> ()
    %cst_43 = arith.constant dense<0.000000e+00> : vector<4x8x8xf32>
    %61 = tpu.matmul %59, %60, %cst_43 {dimension_numbers = #tpu.dot_dimension_numbers<[2], [2], [1], [1], [0, 0, 0, 1, 1, 1], [0], [0]>} : vector<4x8x8xbf16>, vector<4x8x8xbf16>, vector<4x8x8xf32> -> vector<4x8x8xf32>
    "tpu.trace_stop"() : () -> ()
    %62 = vector.shape_cast %31 : vector<1x8xf32> to vector<1x1x8xf32>
    %63 = vector.broadcast %62 : vector<1x1x8xf32> to vector<4x8x8xf32>
    %64 = arith.addf %61, %63 : vector<4x8x8xf32>
    %cst_44 = arith.constant dense<0xFF800000> : vector<4x8xf32>
    %65 = vector.multi_reduction <maximumf>, %64, %cst_44 [2] : vector<4x8x8xf32> to vector<4x8xf32>
    %66 = vector.shape_cast %65 : vector<4x8xf32> to vector<4x8x1xf32>
    %67 = vector.broadcast %66 : vector<4x8x1xf32> to vector<4x8x8xf32>
    %68 = arith.subf %64, %67 : vector<4x8x8xf32>
    %69 = math.exp %68 : vector<4x8x8xf32>
    %cst_45 = arith.constant dense<0.000000e+00> : vector<4x8xf32>
    %70 = vector.multi_reduction <add>, %69, %cst_45 [2] : vector<4x8x8xf32> to vector<4x8xf32>
    %71 = vector.shape_cast %70 : vector<4x8xf32> to vector<4x8x1xf32>
    %72 = tpu.reciprocal %71 {approx = true} : vector<4x8x1xf32> -> vector<4x8x1xf32>
    %73 = vector.broadcast %72 : vector<4x8x1xf32> to vector<4x8x8xf32>
    %74 = arith.mulf %69, %73 : vector<4x8x8xf32>
    %75 = arith.truncf %74 : vector<4x8x8xf32> to vector<4x8x8xbf16>
    %76 = arith.truncf %56 : vector<4x8x8xf32> to vector<4x8x8xbf16>
    "tpu.trace_start"() <{level = 10 : i32, message = "nqk,nkd->nqd"}> : () -> ()
    %cst_46 = arith.constant dense<0.000000e+00> : vector<4x8x8xf32>
    %77 = tpu.matmul %75, %76, %cst_46 {dimension_numbers = #tpu.dot_dimension_numbers<[2], [1], [1], [2], [0, 0, 0, 1, 1, 2], [0], [0]>} : vector<4x8x8xbf16>, vector<4x8x8xbf16>, vector<4x8x8xf32> -> vector<4x8x8xf32>
    "tpu.trace_stop"() : () -> ()
    %78 = arith.truncf %77 : vector<4x8x8xf32> to vector<4x8x8xbf16>
    %c0_47 = arith.constant 0 : index
    %c0_48 = arith.constant 0 : index
    %c0_49 = arith.constant 0 : index
    %c0_50 = arith.constant 0 : index
    %79 = vector.load %arg11[%c0_47, %c0_48, %c0_49, %c0_50] : memref<2x4x8x32xbf16, #tpu.memory_space<vmem>>, vector<1x4x8x32xbf16>
    %80 = vector.shape_cast %79 : vector<1x4x8x32xbf16> to vector<4x8x32xbf16>
    "tpu.trace_start"() <{level = 10 : i32, message = "nsd,ndh->nsh"}> : () -> ()
    %cst_51 = arith.constant dense<0.000000e+00> : vector<4x8x32xf32>
    %81 = tpu.matmul %78, %80, %cst_51 {dimension_numbers = #tpu.dot_dimension_numbers<[2], [1], [1], [2], [0, 0, 0, 1, 1, 2], [0], [0]>} : vector<4x8x8xbf16>, vector<4x8x32xbf16>, vector<4x8x32xf32> -> vector<4x8x32xf32>
    "tpu.trace_stop"() : () -> ()
    %cst_52 = arith.constant dense<0.000000e+00> : vector<8x32xf32>
    %82 = vector.multi_reduction <add>, %81, %cst_52 [0] : vector<4x8x32xf32> to vector<8x32xf32>
    %c0_53 = arith.constant 0 : index
    %c0_54 = arith.constant 0 : index
    %c0_55 = arith.constant 0 : index
    %83 = vector.load %arg12[%c0_53, %c0_54, %c0_55] : memref<2x1x32xf32, #tpu.memory_space<vmem>>, vector<1x1x32xf32>
    %84 = vector.shape_cast %83 : vector<1x1x32xf32> to vector<1x32xf32>
    %85 = vector.broadcast %84 : vector<1x32xf32> to vector<8x32xf32>
    %86 = arith.addf %82, %85 : vector<8x32xf32>
    %87 = arith.addf %25, %86 : vector<8x32xf32>
    %c0_56 = arith.constant 0 : index
    %c0_57 = arith.constant 0 : index
    %c0_58 = arith.constant 0 : index
    %88 = vector.load %arg13[%c0_56, %c0_57, %c0_58] : memref<2x1x32xf32, #tpu.memory_space<vmem>>, vector<1x1x32xf32>
    %89 = vector.shape_cast %88 : vector<1x1x32xf32> to vector<1x32xf32>
    %c0_59 = arith.constant 0 : index
    %c0_60 = arith.constant 0 : index
    %c0_61 = arith.constant 0 : index
    %90 = vector.load %arg14[%c0_59, %c0_60, %c0_61] : memref<2x1x32xf32, #tpu.memory_space<vmem>>, vector<1x1x32xf32>
    %91 = vector.shape_cast %90 : vector<1x1x32xf32> to vector<1x32xf32>
    %cst_62 = arith.constant dense<0.000000e+00> : vector<8xf32>
    %92 = vector.multi_reduction <add>, %87, %cst_62 [1] : vector<8x32xf32> to vector<8xf32>
    %93 = vector.shape_cast %92 : vector<8xf32> to vector<8x1xf32>
    %cst_63 = arith.constant 3.200000e+01 : f32
    %94 = vector.broadcast %cst_63 : f32 to vector<8x1xf32>
    %95 = arith.divf %93, %94 : vector<8x1xf32>
    %96 = vector.broadcast %95 : vector<8x1xf32> to vector<8x32xf32>
    %97 = arith.subf %87, %96 : vector<8x32xf32>
    %98 = arith.mulf %97, %97 : vector<8x32xf32>
    %cst_64 = arith.constant dense<0.000000e+00> : vector<8xf32>
    %99 = vector.multi_reduction <add>, %98, %cst_64 [1] : vector<8x32xf32> to vector<8xf32>
    %100 = vector.shape_cast %99 : vector<8xf32> to vector<8x1xf32>
    %cst_65 = arith.constant 3.200000e+01 : f32
    %101 = vector.broadcast %cst_65 : f32 to vector<8x1xf32>
    %102 = arith.divf %100, %101 : vector<8x1xf32>
    %103 = vector.broadcast %95 : vector<8x1xf32> to vector<8x32xf32>
    %104 = arith.subf %87, %103 : vector<8x32xf32>
    %cst_66 = arith.constant 9.99999996E-13 : f32
    %105 = vector.broadcast %cst_66 : f32 to vector<8x1xf32>
    %106 = arith.addf %102, %105 : vector<8x1xf32>
    %107 = math.rsqrt %106 : vector<8x1xf32>
    %108 = vector.broadcast %107 : vector<8x1xf32> to vector<8x32xf32>
    %109 = arith.mulf %104, %108 : vector<8x32xf32>
    %110 = vector.broadcast %89 : vector<1x32xf32> to vector<8x32xf32>
    %111 = arith.mulf %109, %110 : vector<8x32xf32>
    %112 = vector.broadcast %91 : vector<1x32xf32> to vector<8x32xf32>
    %113 = arith.addf %111, %112 : vector<8x32xf32>
    %114 = arith.truncf %113 : vector<8x32xf32> to vector<8x32xbf16>
    %c0_67 = arith.constant 0 : index
    %c0_68 = arith.constant 0 : index
    %c0_69 = arith.constant 0 : index
    %115 = vector.load %arg15[%c0_67, %c0_68, %c0_69] : memref<2x32x64xbf16, #tpu.memory_space<vmem>>, vector<1x32x64xbf16>
    %116 = vector.shape_cast %115 : vector<1x32x64xbf16> to vector<32x64xbf16>
    %cst_70 = arith.constant dense<0.000000e+00> : vector<8x64xf32>
    %117 = tpu.matmul %114, %116, %cst_70 {dimension_numbers = #tpu.dot_dimension_numbers<[1], [0], [0], [1], [0, 0, 1, 1], [], []>} : vector<8x32xbf16>, vector<32x64xbf16>, vector<8x64xf32> -> vector<8x64xf32>
    %c0_71 = arith.constant 0 : index
    %c0_72 = arith.constant 0 : index
    %c0_73 = arith.constant 0 : index
    %118 = vector.load %arg16[%c0_71, %c0_72, %c0_73] : memref<2x1x64xf32, #tpu.memory_space<vmem>>, vector<1x1x64xf32>
    %119 = vector.shape_cast %118 : vector<1x1x64xf32> to vector<1x64xf32>
    %120 = vector.broadcast %119 : vector<1x64xf32> to vector<8x64xf32>
    %121 = arith.addf %117, %120 : vector<8x64xf32>
    %cst_74 = arith.constant 5.000000e-01 : f32
    %122 = vector.broadcast %cst_74 : f32 to vector<8x64xf32>
    %123 = arith.mulf %122, %121 : vector<8x64xf32>
    %cst_75 = arith.constant 4.471500e-02 : f32
    %124 = vector.broadcast %cst_75 : f32 to vector<8x64xf32>
    %125 = arith.mulf %124, %121 : vector<8x64xf32>
    %126 = arith.mulf %125, %121 : vector<8x64xf32>
    %127 = arith.mulf %126, %121 : vector<8x64xf32>
    %128 = arith.addf %121, %127 : vector<8x64xf32>
    %cst_76 = arith.constant 0.797884583 : f32
    %129 = vector.broadcast %cst_76 : f32 to vector<8x64xf32>
    %130 = arith.mulf %129, %128 : vector<8x64xf32>
    %131 = math.tanh %130 : vector<8x64xf32>
    %cst_77 = arith.constant 1.000000e+00 : f32
    %132 = vector.broadcast %cst_77 : f32 to vector<8x64xf32>
    %133 = arith.addf %132, %131 : vector<8x64xf32>
    %134 = arith.mulf %123, %133 : vector<8x64xf32>
    %135 = arith.truncf %134 : vector<8x64xf32> to vector<8x64xbf16>
    %c0_78 = arith.constant 0 : index
    %c0_79 = arith.constant 0 : index
    %c0_80 = arith.constant 0 : index
    %136 = vector.load %arg17[%c0_78, %c0_79, %c0_80] : memref<2x64x32xbf16, #tpu.memory_space<vmem>>, vector<1x64x32xbf16>
    %137 = vector.shape_cast %136 : vector<1x64x32xbf16> to vector<64x32xbf16>
    %cst_81 = arith.constant dense<0.000000e+00> : vector<8x32xf32>
    %138 = tpu.matmul %135, %137, %cst_81 {dimension_numbers = #tpu.dot_dimension_numbers<[1], [0], [0], [1], [0, 0, 1, 1], [], []>} : vector<8x64xbf16>, vector<64x32xbf16>, vector<8x32xf32> -> vector<8x32xf32>
    %c0_82 = arith.constant 0 : index
    %c0_83 = arith.constant 0 : index
    %c0_84 = arith.constant 0 : index
    %139 = vector.load %arg18[%c0_82, %c0_83, %c0_84] : memref<2x1x32xf32, #tpu.memory_space<vmem>>, vector<1x1x32xf32>
    %140 = vector.shape_cast %139 : vector<1x1x32xf32> to vector<1x32xf32>
    %141 = vector.broadcast %140 : vector<1x32xf32> to vector<8x32xf32>
    %142 = arith.addf %138, %141 : vector<8x32xf32>
    %143 = arith.addf %113, %142 : vector<8x32xf32>
    %c0_85 = arith.constant 0 : index
    %c0_86 = arith.constant 0 : index
    %c0_87 = arith.constant 0 : index
    %144 = vector.load %arg19[%c0_85, %c0_86, %c0_87] : memref<2x1x32xf32, #tpu.memory_space<vmem>>, vector<1x1x32xf32>
    %145 = vector.shape_cast %144 : vector<1x1x32xf32> to vector<1x32xf32>
    %c0_88 = arith.constant 0 : index
    %c0_89 = arith.constant 0 : index
    %c0_90 = arith.constant 0 : index
    %146 = vector.load %arg20[%c0_88, %c0_89, %c0_90] : memref<2x1x32xf32, #tpu.memory_space<vmem>>, vector<1x1x32xf32>
    %147 = vector.shape_cast %146 : vector<1x1x32xf32> to vector<1x32xf32>
    %cst_91 = arith.constant dense<0.000000e+00> : vector<8xf32>
    %148 = vector.multi_reduction <add>, %143, %cst_91 [1] : vector<8x32xf32> to vector<8xf32>
    %149 = vector.shape_cast %148 : vector<8xf32> to vector<8x1xf32>
    %cst_92 = arith.constant 3.200000e+01 : f32
    %150 = vector.broadcast %cst_92 : f32 to vector<8x1xf32>
    %151 = arith.divf %149, %150 : vector<8x1xf32>
    %152 = vector.broadcast %151 : vector<8x1xf32> to vector<8x32xf32>
    %153 = arith.subf %143, %152 : vector<8x32xf32>
    %154 = arith.mulf %153, %153 : vector<8x32xf32>
    %cst_93 = arith.constant dense<0.000000e+00> : vector<8xf32>
    %155 = vector.multi_reduction <add>, %154, %cst_93 [1] : vector<8x32xf32> to vector<8xf32>
    %156 = vector.shape_cast %155 : vector<8xf32> to vector<8x1xf32>
    %cst_94 = arith.constant 3.200000e+01 : f32
    %157 = vector.broadcast %cst_94 : f32 to vector<8x1xf32>
    %158 = arith.divf %156, %157 : vector<8x1xf32>
    %159 = vector.broadcast %151 : vector<8x1xf32> to vector<8x32xf32>
    %160 = arith.subf %143, %159 : vector<8x32xf32>
    %cst_95 = arith.constant 9.99999996E-13 : f32
    %161 = vector.broadcast %cst_95 : f32 to vector<8x1xf32>
    %162 = arith.addf %158, %161 : vector<8x1xf32>
    %163 = math.rsqrt %162 : vector<8x1xf32>
    %164 = vector.broadcast %163 : vector<8x1xf32> to vector<8x32xf32>
    %165 = arith.mulf %160, %164 : vector<8x32xf32>
    %166 = vector.broadcast %145 : vector<1x32xf32> to vector<8x32xf32>
    %167 = arith.mulf %165, %166 : vector<8x32xf32>
    %168 = vector.broadcast %147 : vector<1x32xf32> to vector<8x32xf32>
    %169 = arith.addf %167, %168 : vector<8x32xf32>
    %170 = arith.truncf %169 : vector<8x32xf32> to vector<8x32xbf16>
    %171 = vector.shape_cast %170 : vector<8x32xbf16> to vector<1x8x32xbf16>
    %172 = vector.shape_cast %171 : vector<1x8x32xbf16> to vector<1x8x32xbf16>
    %173 = vector.broadcast %172 : vector<1x8x32xbf16> to vector<4x8x32xbf16>
    %c1 = arith.constant 1 : index
    %c0_96 = arith.constant 0 : index
    %c0_97 = arith.constant 0 : index
    %c0_98 = arith.constant 0 : index
    %174 = vector.load %arg5[%c1, %c0_96, %c0_97, %c0_98] : memref<2x4x32x8xbf16, #tpu.memory_space<vmem>>, vector<1x4x32x8xbf16>
    %175 = vector.shape_cast %174 : vector<1x4x32x8xbf16> to vector<4x32x8xbf16>
    "tpu.trace_start"() <{level = 10 : i32, message = "nsh,nhd->nsd"}> : () -> ()
    %cst_99 = arith.constant dense<0.000000e+00> : vector<4x8x8xf32>
    %176 = tpu.matmul %173, %175, %cst_99 {dimension_numbers = #tpu.dot_dimension_numbers<[2], [1], [1], [2], [0, 0, 0, 1, 1, 2], [0], [0]>} : vector<4x8x32xbf16>, vector<4x32x8xbf16>, vector<4x8x8xf32> -> vector<4x8x8xf32>
    "tpu.trace_stop"() : () -> ()
    %c1_100 = arith.constant 1 : index
    %c0_101 = arith.constant 0 : index
    %c0_102 = arith.constant 0 : index
    %c0_103 = arith.constant 0 : index
    %177 = vector.load %arg6[%c1_100, %c0_101, %c0_102, %c0_103] : memref<2x4x1x8xf32, #tpu.memory_space<vmem>>, vector<1x4x1x8xf32>
    %178 = vector.shape_cast %177 : vector<1x4x1x8xf32> to vector<4x1x8xf32>
    %179 = vector.broadcast %178 : vector<4x1x8xf32> to vector<4x8x8xf32>
    %180 = arith.addf %176, %179 : vector<4x8x8xf32>
    %c1_104 = arith.constant 1 : index
    %c0_105 = arith.constant 0 : index
    %c0_106 = arith.constant 0 : index
    %c0_107 = arith.constant 0 : index
    %181 = vector.load %arg7[%c1_104, %c0_105, %c0_106, %c0_107] : memref<2x4x32x8xbf16, #tpu.memory_space<vmem>>, vector<1x4x32x8xbf16>
    %182 = vector.shape_cast %181 : vector<1x4x32x8xbf16> to vector<4x32x8xbf16>
    "tpu.trace_start"() <{level = 10 : i32, message = "nsh,nhd->nsd"}> : () -> ()
    %cst_108 = arith.constant dense<0.000000e+00> : vector<4x8x8xf32>
    %183 = tpu.matmul %173, %182, %cst_108 {dimension_numbers = #tpu.dot_dimension_numbers<[2], [1], [1], [2], [0, 0, 0, 1, 1, 2], [0], [0]>} : vector<4x8x32xbf16>, vector<4x32x8xbf16>, vector<4x8x8xf32> -> vector<4x8x8xf32>
    "tpu.trace_stop"() : () -> ()
    %c1_109 = arith.constant 1 : index
    %c0_110 = arith.constant 0 : index
    %c0_111 = arith.constant 0 : index
    %c0_112 = arith.constant 0 : index
    %184 = vector.load %arg8[%c1_109, %c0_110, %c0_111, %c0_112] : memref<2x4x1x8xf32, #tpu.memory_space<vmem>>, vector<1x4x1x8xf32>
    %185 = vector.shape_cast %184 : vector<1x4x1x8xf32> to vector<4x1x8xf32>
    %186 = vector.broadcast %185 : vector<4x1x8xf32> to vector<4x8x8xf32>
    %187 = arith.addf %183, %186 : vector<4x8x8xf32>
    %c1_113 = arith.constant 1 : index
    %c0_114 = arith.constant 0 : index
    %c0_115 = arith.constant 0 : index
    %c0_116 = arith.constant 0 : index
    %188 = vector.load %arg9[%c1_113, %c0_114, %c0_115, %c0_116] : memref<2x4x32x8xbf16, #tpu.memory_space<vmem>>, vector<1x4x32x8xbf16>
    %189 = vector.shape_cast %188 : vector<1x4x32x8xbf16> to vector<4x32x8xbf16>
    "tpu.trace_start"() <{level = 10 : i32, message = "nsh,nhd->nsd"}> : () -> ()
    %cst_117 = arith.constant dense<0.000000e+00> : vector<4x8x8xf32>
    %190 = tpu.matmul %173, %189, %cst_117 {dimension_numbers = #tpu.dot_dimension_numbers<[2], [1], [1], [2], [0, 0, 0, 1, 1, 2], [0], [0]>} : vector<4x8x32xbf16>, vector<4x32x8xbf16>, vector<4x8x8xf32> -> vector<4x8x8xf32>
    "tpu.trace_stop"() : () -> ()
    %c1_118 = arith.constant 1 : index
    %c0_119 = arith.constant 0 : index
    %c0_120 = arith.constant 0 : index
    %c0_121 = arith.constant 0 : index
    %191 = vector.load %arg10[%c1_118, %c0_119, %c0_120, %c0_121] : memref<2x4x1x8xf32, #tpu.memory_space<vmem>>, vector<1x4x1x8xf32>
    %192 = vector.shape_cast %191 : vector<1x4x1x8xf32> to vector<4x1x8xf32>
    %193 = vector.broadcast %192 : vector<4x1x8xf32> to vector<4x8x8xf32>
    %194 = arith.addf %190, %193 : vector<4x8x8xf32>
    %cst_122 = arith.constant 0.353553385 : f32
    %195 = vector.broadcast %cst_122 : f32 to vector<4x8x8xf32>
    %196 = arith.mulf %180, %195 : vector<4x8x8xf32>
    %197 = arith.truncf %196 : vector<4x8x8xf32> to vector<4x8x8xbf16>
    %198 = arith.truncf %187 : vector<4x8x8xf32> to vector<4x8x8xbf16>
    "tpu.trace_start"() <{level = 10 : i32, message = "nqd,nkd->nqk"}> : () -> ()
    %cst_123 = arith.constant dense<0.000000e+00> : vector<4x8x8xf32>
    %199 = tpu.matmul %197, %198, %cst_123 {dimension_numbers = #tpu.dot_dimension_numbers<[2], [2], [1], [1], [0, 0, 0, 1, 1, 1], [0], [0]>} : vector<4x8x8xbf16>, vector<4x8x8xbf16>, vector<4x8x8xf32> -> vector<4x8x8xf32>
    "tpu.trace_stop"() : () -> ()
    %200 = vector.shape_cast %31 : vector<1x8xf32> to vector<1x1x8xf32>
    %201 = vector.broadcast %200 : vector<1x1x8xf32> to vector<4x8x8xf32>
    %202 = arith.addf %199, %201 : vector<4x8x8xf32>
    %cst_124 = arith.constant dense<0xFF800000> : vector<4x8xf32>
    %203 = vector.multi_reduction <maximumf>, %202, %cst_124 [2] : vector<4x8x8xf32> to vector<4x8xf32>
    %204 = vector.shape_cast %203 : vector<4x8xf32> to vector<4x8x1xf32>
    %205 = vector.broadcast %204 : vector<4x8x1xf32> to vector<4x8x8xf32>
    %206 = arith.subf %202, %205 : vector<4x8x8xf32>
    %207 = math.exp %206 : vector<4x8x8xf32>
    %cst_125 = arith.constant dense<0.000000e+00> : vector<4x8xf32>
    %208 = vector.multi_reduction <add>, %207, %cst_125 [2] : vector<4x8x8xf32> to vector<4x8xf32>
    %209 = vector.shape_cast %208 : vector<4x8xf32> to vector<4x8x1xf32>
    %210 = tpu.reciprocal %209 {approx = true} : vector<4x8x1xf32> -> vector<4x8x1xf32>
    %211 = vector.broadcast %210 : vector<4x8x1xf32> to vector<4x8x8xf32>
    %212 = arith.mulf %207, %211 : vector<4x8x8xf32>
    %213 = arith.truncf %212 : vector<4x8x8xf32> to vector<4x8x8xbf16>
    %214 = arith.truncf %194 : vector<4x8x8xf32> to vector<4x8x8xbf16>
    "tpu.trace_start"() <{level = 10 : i32, message = "nqk,nkd->nqd"}> : () -> ()
    %cst_126 = arith.constant dense<0.000000e+00> : vector<4x8x8xf32>
    %215 = tpu.matmul %213, %214, %cst_126 {dimension_numbers = #tpu.dot_dimension_numbers<[2], [1], [1], [2], [0, 0, 0, 1, 1, 2], [0], [0]>} : vector<4x8x8xbf16>, vector<4x8x8xbf16>, vector<4x8x8xf32> -> vector<4x8x8xf32>
    "tpu.trace_stop"() : () -> ()
    %216 = arith.truncf %215 : vector<4x8x8xf32> to vector<4x8x8xbf16>
    %c1_127 = arith.constant 1 : index
    %c0_128 = arith.constant 0 : index
    %c0_129 = arith.constant 0 : index
    %c0_130 = arith.constant 0 : index
    %217 = vector.load %arg11[%c1_127, %c0_128, %c0_129, %c0_130] : memref<2x4x8x32xbf16, #tpu.memory_space<vmem>>, vector<1x4x8x32xbf16>
    %218 = vector.shape_cast %217 : vector<1x4x8x32xbf16> to vector<4x8x32xbf16>
    "tpu.trace_start"() <{level = 10 : i32, message = "nsd,ndh->nsh"}> : () -> ()
    %cst_131 = arith.constant dense<0.000000e+00> : vector<4x8x32xf32>
    %219 = tpu.matmul %216, %218, %cst_131 {dimension_numbers = #tpu.dot_dimension_numbers<[2], [1], [1], [2], [0, 0, 0, 1, 1, 2], [0], [0]>} : vector<4x8x8xbf16>, vector<4x8x32xbf16>, vector<4x8x32xf32> -> vector<4x8x32xf32>
    "tpu.trace_stop"() : () -> ()
    %cst_132 = arith.constant dense<0.000000e+00> : vector<8x32xf32>
    %220 = vector.multi_reduction <add>, %219, %cst_132 [0] : vector<4x8x32xf32> to vector<8x32xf32>
    %c1_133 = arith.constant 1 : index
    %c0_134 = arith.constant 0 : index
    %c0_135 = arith.constant 0 : index
    %221 = vector.load %arg12[%c1_133, %c0_134, %c0_135] : memref<2x1x32xf32, #tpu.memory_space<vmem>>, vector<1x1x32xf32>
    %222 = vector.shape_cast %221 : vector<1x1x32xf32> to vector<1x32xf32>
    %223 = vector.broadcast %222 : vector<1x32xf32> to vector<8x32xf32>
    %224 = arith.addf %220, %223 : vector<8x32xf32>
    %225 = arith.addf %169, %224 : vector<8x32xf32>
    %c1_136 = arith.constant 1 : index
    %c0_137 = arith.constant 0 : index
    %c0_138 = arith.constant 0 : index
    %226 = vector.load %arg13[%c1_136, %c0_137, %c0_138] : memref<2x1x32xf32, #tpu.memory_space<vmem>>, vector<1x1x32xf32>
    %227 = vector.shape_cast %226 : vector<1x1x32xf32> to vector<1x32xf32>
    %c1_139 = arith.constant 1 : index
    %c0_140 = arith.constant 0 : index
    %c0_141 = arith.constant 0 : index
    %228 = vector.load %arg14[%c1_139, %c0_140, %c0_141] : memref<2x1x32xf32, #tpu.memory_space<vmem>>, vector<1x1x32xf32>
    %229 = vector.shape_cast %228 : vector<1x1x32xf32> to vector<1x32xf32>
    %cst_142 = arith.constant dense<0.000000e+00> : vector<8xf32>
    %230 = vector.multi_reduction <add>, %225, %cst_142 [1] : vector<8x32xf32> to vector<8xf32>
    %231 = vector.shape_cast %230 : vector<8xf32> to vector<8x1xf32>
    %cst_143 = arith.constant 3.200000e+01 : f32
    %232 = vector.broadcast %cst_143 : f32 to vector<8x1xf32>
    %233 = arith.divf %231, %232 : vector<8x1xf32>
    %234 = vector.broadcast %233 : vector<8x1xf32> to vector<8x32xf32>
    %235 = arith.subf %225, %234 : vector<8x32xf32>
    %236 = arith.mulf %235, %235 : vector<8x32xf32>
    %cst_144 = arith.constant dense<0.000000e+00> : vector<8xf32>
    %237 = vector.multi_reduction <add>, %236, %cst_144 [1] : vector<8x32xf32> to vector<8xf32>
    %238 = vector.shape_cast %237 : vector<8xf32> to vector<8x1xf32>
    %cst_145 = arith.constant 3.200000e+01 : f32
    %239 = vector.broadcast %cst_145 : f32 to vector<8x1xf32>
    %240 = arith.divf %238, %239 : vector<8x1xf32>
    %241 = vector.broadcast %233 : vector<8x1xf32> to vector<8x32xf32>
    %242 = arith.subf %225, %241 : vector<8x32xf32>
    %cst_146 = arith.constant 9.99999996E-13 : f32
    %243 = vector.broadcast %cst_146 : f32 to vector<8x1xf32>
    %244 = arith.addf %240, %243 : vector<8x1xf32>
    %245 = math.rsqrt %244 : vector<8x1xf32>
    %246 = vector.broadcast %245 : vector<8x1xf32> to vector<8x32xf32>
    %247 = arith.mulf %242, %246 : vector<8x32xf32>
    %248 = vector.broadcast %227 : vector<1x32xf32> to vector<8x32xf32>
    %249 = arith.mulf %247, %248 : vector<8x32xf32>
    %250 = vector.broadcast %229 : vector<1x32xf32> to vector<8x32xf32>
    %251 = arith.addf %249, %250 : vector<8x32xf32>
    %252 = arith.truncf %251 : vector<8x32xf32> to vector<8x32xbf16>
    %c1_147 = arith.constant 1 : index
    %c0_148 = arith.constant 0 : index
    %c0_149 = arith.constant 0 : index
    %253 = vector.load %arg15[%c1_147, %c0_148, %c0_149] : memref<2x32x64xbf16, #tpu.memory_space<vmem>>, vector<1x32x64xbf16>
    %254 = vector.shape_cast %253 : vector<1x32x64xbf16> to vector<32x64xbf16>
    %cst_150 = arith.constant dense<0.000000e+00> : vector<8x64xf32>
    %255 = tpu.matmul %252, %254, %cst_150 {dimension_numbers = #tpu.dot_dimension_numbers<[1], [0], [0], [1], [0, 0, 1, 1], [], []>} : vector<8x32xbf16>, vector<32x64xbf16>, vector<8x64xf32> -> vector<8x64xf32>
    %c1_151 = arith.constant 1 : index
    %c0_152 = arith.constant 0 : index
    %c0_153 = arith.constant 0 : index
    %256 = vector.load %arg16[%c1_151, %c0_152, %c0_153] : memref<2x1x64xf32, #tpu.memory_space<vmem>>, vector<1x1x64xf32>
    %257 = vector.shape_cast %256 : vector<1x1x64xf32> to vector<1x64xf32>
    %258 = vector.broadcast %257 : vector<1x64xf32> to vector<8x64xf32>
    %259 = arith.addf %255, %258 : vector<8x64xf32>
    %cst_154 = arith.constant 5.000000e-01 : f32
    %260 = vector.broadcast %cst_154 : f32 to vector<8x64xf32>
    %261 = arith.mulf %260, %259 : vector<8x64xf32>
    %cst_155 = arith.constant 4.471500e-02 : f32
    %262 = vector.broadcast %cst_155 : f32 to vector<8x64xf32>
    %263 = arith.mulf %262, %259 : vector<8x64xf32>
    %264 = arith.mulf %263, %259 : vector<8x64xf32>
    %265 = arith.mulf %264, %259 : vector<8x64xf32>
    %266 = arith.addf %259, %265 : vector<8x64xf32>
    %cst_156 = arith.constant 0.797884583 : f32
    %267 = vector.broadcast %cst_156 : f32 to vector<8x64xf32>
    %268 = arith.mulf %267, %266 : vector<8x64xf32>
    %269 = math.tanh %268 : vector<8x64xf32>
    %cst_157 = arith.constant 1.000000e+00 : f32
    %270 = vector.broadcast %cst_157 : f32 to vector<8x64xf32>
    %271 = arith.addf %270, %269 : vector<8x64xf32>
    %272 = arith.mulf %261, %271 : vector<8x64xf32>
    %273 = arith.truncf %272 : vector<8x64xf32> to vector<8x64xbf16>
    %c1_158 = arith.constant 1 : index
    %c0_159 = arith.constant 0 : index
    %c0_160 = arith.constant 0 : index
    %274 = vector.load %arg17[%c1_158, %c0_159, %c0_160] : memref<2x64x32xbf16, #tpu.memory_space<vmem>>, vector<1x64x32xbf16>
    %275 = vector.shape_cast %274 : vector<1x64x32xbf16> to vector<64x32xbf16>
    %cst_161 = arith.constant dense<0.000000e+00> : vector<8x32xf32>
    %276 = tpu.matmul %273, %275, %cst_161 {dimension_numbers = #tpu.dot_dimension_numbers<[1], [0], [0], [1], [0, 0, 1, 1], [], []>} : vector<8x64xbf16>, vector<64x32xbf16>, vector<8x32xf32> -> vector<8x32xf32>
    %c1_162 = arith.constant 1 : index
    %c0_163 = arith.constant 0 : index
    %c0_164 = arith.constant 0 : index
    %277 = vector.load %arg18[%c1_162, %c0_163, %c0_164] : memref<2x1x32xf32, #tpu.memory_space<vmem>>, vector<1x1x32xf32>
    %278 = vector.shape_cast %277 : vector<1x1x32xf32> to vector<1x32xf32>
    %279 = vector.broadcast %278 : vector<1x32xf32> to vector<8x32xf32>
    %280 = arith.addf %276, %279 : vector<8x32xf32>
    %281 = arith.addf %251, %280 : vector<8x32xf32>
    %c1_165 = arith.constant 1 : index
    %c0_166 = arith.constant 0 : index
    %c0_167 = arith.constant 0 : index
    %282 = vector.load %arg19[%c1_165, %c0_166, %c0_167] : memref<2x1x32xf32, #tpu.memory_space<vmem>>, vector<1x1x32xf32>
    %283 = vector.shape_cast %282 : vector<1x1x32xf32> to vector<1x32xf32>
    %c1_168 = arith.constant 1 : index
    %c0_169 = arith.constant 0 : index
    %c0_170 = arith.constant 0 : index
    %284 = vector.load %arg20[%c1_168, %c0_169, %c0_170] : memref<2x1x32xf32, #tpu.memory_space<vmem>>, vector<1x1x32xf32>
    %285 = vector.shape_cast %284 : vector<1x1x32xf32> to vector<1x32xf32>
    %cst_171 = arith.constant dense<0.000000e+00> : vector<8xf32>
    %286 = vector.multi_reduction <add>, %281, %cst_171 [1] : vector<8x32xf32> to vector<8xf32>
    %287 = vector.shape_cast %286 : vector<8xf32> to vector<8x1xf32>
    %cst_172 = arith.constant 3.200000e+01 : f32
    %288 = vector.broadcast %cst_172 : f32 to vector<8x1xf32>
    %289 = arith.divf %287, %288 : vector<8x1xf32>
    %290 = vector.broadcast %289 : vector<8x1xf32> to vector<8x32xf32>
    %291 = arith.subf %281, %290 : vector<8x32xf32>
    %292 = arith.mulf %291, %291 : vector<8x32xf32>
    %cst_173 = arith.constant dense<0.000000e+00> : vector<8xf32>
    %293 = vector.multi_reduction <add>, %292, %cst_173 [1] : vector<8x32xf32> to vector<8xf32>
    %294 = vector.shape_cast %293 : vector<8xf32> to vector<8x1xf32>
    %cst_174 = arith.constant 3.200000e+01 : f32
    %295 = vector.broadcast %cst_174 : f32 to vector<8x1xf32>
    %296 = arith.divf %294, %295 : vector<8x1xf32>
    %297 = vector.broadcast %289 : vector<8x1xf32> to vector<8x32xf32>
    %298 = arith.subf %281, %297 : vector<8x32xf32>
    %cst_175 = arith.constant 9.99999996E-13 : f32
    %299 = vector.broadcast %cst_175 : f32 to vector<8x1xf32>
    %300 = arith.addf %296, %299 : vector<8x1xf32>
    %301 = math.rsqrt %300 : vector<8x1xf32>
    %302 = vector.broadcast %301 : vector<8x1xf32> to vector<8x32xf32>
    %303 = arith.mulf %298, %302 : vector<8x32xf32>
    %304 = vector.broadcast %283 : vector<1x32xf32> to vector<8x32xf32>
    %305 = arith.mulf %303, %304 : vector<8x32xf32>
    %306 = vector.broadcast %285 : vector<1x32xf32> to vector<8x32xf32>
    %307 = arith.addf %305, %306 : vector<8x32xf32>
    %308 = vector.shape_cast %307 : vector<8x32xf32> to vector<1x8x32xf32>
    %c0_176 = arith.constant 0 : index
    %c0_177 = arith.constant 0 : index
    %c0_178 = arith.constant 0 : index
    %309 = vector.load %arg23[%c0_176, %c0_177, %c0_178] : memref<1x8x32xf32, #tpu.memory_space<vmem>>, vector<1x8x32xf32>
    tpu.vector_store %arg23[%c0_176, %c0_177, %c0_178], %308 {strides = array<i32>} : memref<1x8x32xf32, #tpu.memory_space<vmem>>, vector<1x8x32xf32>,
    %310 = vector.extract_strided_slice %307 {offsets = [0, 0], sizes = [1, 32], strides = [1, 1]} : vector<8x32xf32> to vector<1x32xf32>
    %311 = arith.truncf %310 : vector<1x32xf32> to vector<1x32xbf16>
    %c0_179 = arith.constant 0 : index
    %c0_180 = arith.constant 0 : index
    %312 = vector.load %arg21[%c0_179, %c0_180] : memref<32x32xbf16, #tpu.memory_space<vmem>>, vector<32x32xbf16>
    %cst_181 = arith.constant dense<0.000000e+00> : vector<1x32xf32>
    %313 = tpu.matmul %311, %312, %cst_181 {dimension_numbers = #tpu.dot_dimension_numbers<[1], [0], [0], [1], [0, 0, 1, 1], [], []>} : vector<1x32xbf16>, vector<32x32xbf16>, vector<1x32xf32> -> vector<1x32xf32>
    %c0_182 = arith.constant 0 : index
    %c0_183 = arith.constant 0 : index
    %314 = vector.load %arg22[%c0_182, %c0_183] : memref<1x32xf32, #tpu.memory_space<vmem>>, vector<1x32xf32>
    %315 = arith.addf %313, %314 : vector<1x32xf32>
    %316 = math.tanh %315 : vector<1x32xf32>
    %317 = vector.shape_cast %316 : vector<1x32xf32> to vector<1x1x32xf32>
    %c0_184 = arith.constant 0 : index
    %c0_185 = arith.constant 0 : index
    %c0_186 = arith.constant 0 : index
    %318 = vector.load %arg24[%c0_184, %c0_185, %c0_186] : memref<1x1x32xf32, #tpu.memory_space<vmem>>, vector<1x1x32xf32>
    tpu.vector_store %arg24[%c0_184, %c0_185, %c0_186], %317 {strides = array<i32>} : memref<1x1x32xf32, #tpu.memory_space<vmem>>, vector<1x1x32xf32>,
    return
  }
  func.func @transform_0(%arg0: i32) -> (i32, i32, i32) {
    %c0_i32 = arith.constant 0 : i32
    %c0_i32_0 = arith.constant 0 : i32
    %c0_i32_1 = arith.constant 0 : i32
    return %arg0, %c0_i32, %c0_i32_0 : i32, i32, i32
  }
  func.func @transform_1(%arg0: i32) -> (i32, i32, i32) {
    %c0_i32 = arith.constant 0 : i32
    %c0_i32_0 = arith.constant 0 : i32
    %c0_i32_1 = arith.constant 0 : i32
    return %arg0, %c0_i32, %c0_i32_0 : i32, i32, i32
  }
  func.func @transform_2(%arg0: i32) -> (i32, i32) {
    %c0_i32 = arith.constant 0 : i32
    %c0_i32_0 = arith.constant 0 : i32
    %c0_i32_1 = arith.constant 0 : i32
    return %c0_i32, %c0_i32_0 : i32, i32
  }
  func.func @transform_3(%arg0: i32) -> (i32, i32) {
    %c0_i32 = arith.constant 0 : i32
    %c0_i32_0 = arith.constant 0 : i32
    %c0_i32_1 = arith.constant 0 : i32
    return %c0_i32, %c0_i32_0 : i32, i32
  }
  func.func @transform_4(%arg0: i32) -> (i32, i32, i32, i32) {
    %c0_i32 = arith.constant 0 : i32
    %c0_i32_0 = arith.constant 0 : i32
    %c0_i32_1 = arith.constant 0 : i32
    %c0_i32_2 = arith.constant 0 : i32
    %c0_i32_3 = arith.constant 0 : i32
    return %c0_i32, %c0_i32_0, %c0_i32_1, %c0_i32_2 : i32, i32, i32, i32
  }
  func.func @transform_5(%arg0: i32) -> (i32, i32, i32, i32) {
    %c0_i32 = arith.constant 0 : i32
    %c0_i32_0 = arith.constant 0 : i32
    %c0_i32_1 = arith.constant 0 : i32
    %c0_i32_2 = arith.constant 0 : i32
    %c0_i32_3 = arith.constant 0 : i32
    return %c0_i32, %c0_i32_0, %c0_i32_1, %c0_i32_2 : i32, i32, i32, i32
  }
  func.func @transform_6(%arg0: i32) -> (i32, i32, i32, i32) {
    %c0_i32 = arith.constant 0 : i32
    %c0_i32_0 = arith.constant 0 : i32
    %c0_i32_1 = arith.constant 0 : i32
    %c0_i32_2 = arith.constant 0 : i32
    %c0_i32_3 = arith.constant 0 : i32
    return %c0_i32, %c0_i32_0, %c0_i32_1, %c0_i32_2 : i32, i32, i32, i32
  }
  func.func @transform_7(%arg0: i32) -> (i32, i32, i32, i32) {
    %c0_i32 = arith.constant 0 : i32
    %c0_i32_0 = arith.constant 0 : i32
    %c0_i32_1 = arith.constant 0 : i32
    %c0_i32_2 = arith.constant 0 : i32
    %c0_i32_3 = arith.constant 0 : i32
    return %c0_i32, %c0_i32_0, %c0_i32_1, %c0_i32_2 : i32, i32, i32, i32
  }
  func.func @transform_8(%arg0: i32) -> (i32, i32, i32, i32) {
    %c0_i32 = arith.constant 0 : i32
    %c0_i32_0 = arith.constant 0 : i32
    %c0_i32_1 = arith.constant 0 : i32
    %c0_i32_2 = arith.constant 0 : i32
    %c0_i32_3 = arith.constant 0 : i32
    return %c0_i32, %c0_i32_0, %c0_i32_1, %c0_i32_2 : i32, i32, i32, i32
  }
  func.func @transform_9(%arg0: i32) -> (i32, i32, i32, i32) {
    %c0_i32 = arith.constant 0 : i32
    %c0_i32_0 = arith.constant 0 : i32
    %c0_i32_1 = arith.constant 0 : i32
    %c0_i32_2 = arith.constant 0 : i32
    %c0_i32_3 = arith.constant 0 : i32
    return %c0_i32, %c0_i32_0, %c0_i32_1, %c0_i32_2 : i32, i32, i32, i32
  }
  func.func @transform_10(%arg0: i32) -> (i32, i32, i32, i32) {
    %c0_i32 = arith.constant 0 : i32
    %c0_i32_0 = arith.constant 0 : i32
    %c0_i32_1 = arith.constant 0 : i32
    %c0_i32_2 = arith.constant 0 : i32
    %c0_i32_3 = arith.constant 0 : i32
    return %c0_i32, %c0_i32_0, %c0_i32_1, %c0_i32_2 : i32, i32, i32, i32
  }
  func.func @transform_11(%arg0: i32) -> (i32, i32, i32) {
    %c0_i32 = arith.constant 0 : i32
    %c0_i32_0 = arith.constant 0 : i32
    %c0_i32_1 = arith.constant 0 : i32
    %c0_i32_2 = arith.constant 0 : i32
    return %c0_i32, %c0_i32_0, %c0_i32_1 : i32, i32, i32
  }
  func.func @transform_12(%arg0: i32) -> (i32, i32, i32) {
    %c0_i32 = arith.constant 0 : i32
    %c0_i32_0 = arith.constant 0 : i32
    %c0_i32_1 = arith.constant 0 : i32
    %c0_i32_2 = arith.constant 0 : i32
    return %c0_i32, %c0_i32_0, %c0_i32_1 : i32, i32, i32
  }
  func.func @transform_13(%arg0: i32) -> (i32, i32, i32) {
    %c0_i32 = arith.constant 0 : i32
    %c0_i32_0 = arith.constant 0 : i32
    %c0_i32_1 = arith.constant 0 : i32
    %c0_i32_2 = arith.constant 0 : i32
    return %c0_i32, %c0_i32_0, %c0_i32_1 : i32, i32, i32
  }
  func.func @transform_14(%arg0: i32) -> (i32, i32, i32) {
    %c0_i32 = arith.constant 0 : i32
    %c0_i32_0 = arith.constant 0 : i32
    %c0_i32_1 = arith.constant 0 : i32
    %c0_i32_2 = arith.constant 0 : i32
    return %c0_i32, %c0_i32_0, %c0_i32_1 : i32, i32, i32
  }
  func.func @transform_15(%arg0: i32) -> (i32, i32, i32) {
    %c0_i32 = arith.constant 0 : i32
    %c0_i32_0 = arith.constant 0 : i32
    %c0_i32_1 = arith.constant 0 : i32
    %c0_i32_2 = arith.constant 0 : i32
    return %c0_i32, %c0_i32_0, %c0_i32_1 : i32, i32, i32
  }
  func.func @transform_16(%arg0: i32) -> (i32, i32, i32) {
    %c0_i32 = arith.constant 0 : i32
    %c0_i32_0 = arith.constant 0 : i32
    %c0_i32_1 = arith.constant 0 : i32
    %c0_i32_2 = arith.constant 0 : i32
    return %c0_i32, %c0_i32_0, %c0_i32_1 : i32, i32, i32
  }
  func.func @transform_17(%arg0: i32) -> (i32, i32, i32) {
    %c0_i32 = arith.constant 0 : i32
    %c0_i32_0 = arith.constant 0 : i32
    %c0_i32_1 = arith.constant 0 : i32
    %c0_i32_2 = arith.constant 0 : i32
    return %c0_i32, %c0_i32_0, %c0_i32_1 : i32, i32, i32
  }
  func.func @transform_18(%arg0: i32) -> (i32, i32, i32) {
    %c0_i32 = arith.constant 0 : i32
    %c0_i32_0 = arith.constant 0 : i32
    %c0_i32_1 = arith.constant 0 : i32
    %c0_i32_2 = arith.constant 0 : i32
    return %c0_i32, %c0_i32_0, %c0_i32_1 : i32, i32, i32
  }
  func.func @transform_19(%arg0: i32) -> (i32, i32, i32) {
    %c0_i32 = arith.constant 0 : i32
    %c0_i32_0 = arith.constant 0 : i32
    %c0_i32_1 = arith.constant 0 : i32
    %c0_i32_2 = arith.constant 0 : i32
    return %c0_i32, %c0_i32_0, %c0_i32_1 : i32, i32, i32
  }
  func.func @transform_20(%arg0: i32) -> (i32, i32) {
    %c0_i32 = arith.constant 0 : i32
    %c0_i32_0 = arith.constant 0 : i32
    %c0_i32_1 = arith.constant 0 : i32
    return %c0_i32, %c0_i32_0 : i32, i32
  }
  func.func @transform_21(%arg0: i32) -> (i32, i32) {
    %c0_i32 = arith.constant 0 : i32
    %c0_i32_0 = arith.constant 0 : i32
    %c0_i32_1 = arith.constant 0 : i32
    return %c0_i32, %c0_i32_0 : i32, i32
  }
  func.func @transform_22(%arg0: i32) -> (i32, i32, i32) {
    %c0_i32 = arith.constant 0 : i32
    %c0_i32_0 = arith.constant 0 : i32
    %c0_i32_1 = arith.constant 0 : i32
    return %arg0, %c0_i32, %c0_i32_0 : i32, i32, i32
  }
  func.func @transform_23(%arg0: i32) -> (i32, i32, i32) {
    %c0_i32 = arith.constant 0 : i32
    %c0_i32_0 = arith.constant 0 : i32
    %c0_i32_1 = arith.constant 0 : i32
    return %arg0, %c0_i32, %c0_i32_0 : i32, i32, i32
  }
}

</mosaic_0001>

<bundles_post_ra>
// kernel: bert_embedding_layer_forward.1
= control target key start
LH: loop header
LB: loop body
LE: loop exit
PB: predicated region body
PF: predicated region fallthrough
CT: control target
= control target key end

     0   :  { %s4115_s0 = inlined_call_operand.vmem [shape: f32[2,8,32], index: 0, kind: input, shape index: {}]   ;;  %s4116_s1 = inlined_call_operand.vmem [shape: f32[2,1,8], index: 1, kind: input, shape index: {}]   ;;  %s4117_s2 = inlined_call_operand.vmem [shape: f32[1,32], index: 2, kind: input, shape index: {}]   ;;  %s4118_s3 = inlined_call_operand.vmem [shape: f32[1,32], index: 3, kind: input, shape index: {}]   ;;  %s4119_s4 = inlined_call_operand.vmem [shape: bf16[2,4,32,8], index: 4, kind: input, shape index: {}]   ;;  %s4120_s5 = inlined_call_operand.vmem [shape: f32[2,4,1,8], index: 5, kind: input, shape index: {}]   ;;  %s4121_s6 = inlined_call_operand.vmem [shape: bf16[2,4,32,8], index: 6, kind: input, shape index: {}]   ;;  %s4122_s7 = inlined_call_operand.vmem [shape: f32[2,4,1,8], index: 7, kind: input, shape index: {}]   ;;  %s4123_s8 = inlined_call_operand.vmem [shape: bf16[2,4,32,8], index: 8, kind: input, shape index: {}]   ;;  %s4124_s9 = inlined_call_operand.vmem [shape: f32[2,4,1,8], index: 9, kind: input, shape index: {}]   ;;  %s4125_s10 = inlined_call_operand.vmem [shape: bf16[2,4,8,32], index: 10, kind: input, shape index: {}]   ;;  %s4126_s11 = inlined_call_operand.vmem [shape: f32[2,1,32], index: 11, kind: input, shape index: {}]   ;;  %s4127_s12 = inlined_call_operand.vmem [shape: f32[2,1,32], index: 12, kind: input, shape index: {}]   ;;  %s4128_s13 = inlined_call_operand.vmem [shape: f32[2,1,32], index: 13, kind: input, shape index: {}]   ;;  %s4129_s14 = inlined_call_operand.vmem [shape: bf16[2,32,64], index: 14, kind: input, shape index: {}]   ;;  %s4130_s15 = inlined_call_operand.vmem [shape: f32[2,1,64], index: 15, kind: input, shape index: {}]   ;;  %s4131_s16 = inlined_call_operand.vmem [shape: bf16[2,64,32], index: 16, kind: input, shape index: {}]   ;;  %s4132_s17 = inlined_call_operand.vmem [shape: f32[2,1,32], index: 17, kind: input, shape index: {}]   ;;  %s4133_s18 = inlined_call_operand.vmem [shape: f32[2,1,32], index: 18, kind: input, shape index: {}]   ;;  %s4134_s19 = inlined_call_operand.vmem [shape: f32[2,1,32], index: 19, kind: input, shape index: {}]   ;;  %s4135_s20 = inlined_call_operand.vmem [shape: bf16[32,32], index: 20, kind: input, shape index: {}]   ;;  %s4136_s21 = inlined_call_operand.vmem [shape: f32[1,32], index: 21, kind: input, shape index: {}]   ;;  %s4137_s22 = inlined_call_operand.hbm [shape: f32[2,8,32], index: 22, kind: output, shape index: {0}]   ;;  %s4138_s23 = inlined_call_operand.hbm [shape: f32[2,1,32], index: 23, kind: output, shape index: {1}]  }
   0x1   :  { %4152 = sst [smem:[#allocation14_spill]] %s4115_s0 }
   0x2   :  { %4153 = sst [smem:[#allocation15_spill]] %s4116_s1 }
   0x3   :  { %4154 = sst [smem:[#allocation16_spill]] %s4117_s2 }
   0x4   :  { %4155 = sst [smem:[#allocation17_spill]] %s4118_s3 }
   0x5   :  { %4156 = sst [smem:[#allocation18_spill]] %s4119_s4 }
   0x6   :  { %4157 = sst [smem:[#allocation19_spill]] %s4120_s5 }
   0x7   :  { %4158 = sst [smem:[#allocation20_spill]] %s4121_s6 }
   0x8   :  { %4159 = sst [smem:[#allocation21_spill]] %s4122_s7 }
   0x9   :  { %4160 = sst [smem:[#allocation22_spill]] %s4123_s8 }
   0xa   :  { %4161 = sst [smem:[#allocation23_spill]] %s4124_s9 }
   0xb   :  { %4162 = sst [smem:[#allocation24_spill]] %s4125_s10 }
   0xc   :  { %4163 = sst [smem:[#allocation25_spill]] %s4126_s11 }
   0xd   :  { %4164 = sst [smem:[#allocation26_spill]] %s4136_s21 }
   0xe   :  { %4165 = sst [smem:[#allocation27_spill]] %s4138_s23 }
   0xf   :  { %29 = vsyncpa [#allocation3], 0 }
  0x10   :  { %31 = vsyncpa [#allocation3 + $0x1], 0 }
  0x11   :  { %32 = vsyncpa [#allocation5], 0 }
  0x12   :  { %34 = vsyncpa [#allocation5 + $0x1], 0  ;;  %s3526_s4 = smov 0   ;;  %s3528_s30 = smov 0  }
  0x13   :  { %s3530_s24 = smov 0   ;;  %s3532_s25 = smov 0  }
  0x14 LB: > { %4166 = sst [smem:[#allocation8_spill]] %s3391_s4  ;;  %s3547_s5 = sadd.s32 4294967295, %s3403_s25   ;;  %s3403_s25 = sphi %s3532_s25, %s4192_s25   ;;  %s3399_s24 = sphi %s3530_s24, %s4197_s24   ;;  %s3395_s30 = sphi %s3528_s30, %s4196_s30   ;;  %s3391_s4 = sphi %s3526_s4, %s4195_s4  }
  0x15   : > { %4167 = sst [smem:[#allocation9_spill]] %s3399_s24  ;;  %s2718_s1 = sadd.s32 4294967294, %s3403_s25  }
  0x16   : > { %4168 = sst [smem:[#allocation10_spill]] %s3403_s25  ;;  %s3551_s26 = sadd.s32 1, %s3403_s25  }
  0x17   : > { %4169 = sst [smem:[#allocation11_spill]] %s3551_s26  ;;  %s519_s2 = sadd.s32 1, %s3399_s24 }
  0x18   : > { %s516_s6 = ssub.s32 %s3403_s25, %s3551_s26  ;;  %p529_p0 = scmp.ne.s32.totalorder %s3399_s24, %s3395_s30 }
  0x19   : > { %p517_p1 = scmp.eq.s32.totalorder %s516_s6, 0  ;;  %p530_p2 = scmp.eq.s32.totalorder %s3547_s5, 1 }
  0x1a   : > { %p535_p3 = scmp.ne.s32.totalorder %s3395_s30, %s3391_s4  ;;  %p536_p4 = scmp.eq.s32.totalorder %s2718_s1, 1 }
  0x1b   : > { %s3562_s27 = scalar_select %p517_p1, %s3399_s24, %s519_s2  }
  0x1c   : > { %p3564_p5 = por %p530_p2, %p529_p0  ;;  %p3568_p6 = por %p536_p4, %p535_p3 }
  0x1d   : > { %4170 = sst [smem:[#allocation12_spill]] %s3562_s27  ;;  %p2721_p7 = scmp.ge.s32.totalorder %s3403_s25, 1 }
  0x1e   : > { %s4172_s28 = scalar_select %p3568_p6, 1, 0 }
  0x1f   : > { %p653_p8 = scmp.lt.s32.totalorder %s3403_s25, 3 }
  0x20   : > { %4173 = sst [smem:[#allocation13_spill]] %s4172_s28 }
  0x21   : > { %p654_p9 = pnand %p2721_p7, %p653_p8 }
  0x22   : > { %p723_p10 = scmp.lt.s32.totalorder (!%p654_p9), %s3547_s5, 1  ;;  %s4174_s2 = sld [smem:[#allocation14_spill]] (!%p654_p9) }
  0x23   : > { %657 = sbr.rel (%p654_p9) target bundleno = 3767 (0xeb7), region = 108  ;;  %s4175_s1 = sld [smem:[#allocation18_spill]] (!%p654_p9) }
  0x24   : > { %s4176_s25 = sld [smem:[#allocation20_spill]] (!%p654_p9) }
  0x25   : > { %s4179_s26 = sld [smem:[#allocation17_spill]] (!%p654_p9) }
  0x26   : > { %s4180_s8 = sld [smem:[#allocation22_spill]] (!%p654_p9) }
  0x27   : > { %s4182_s23 = sld [smem:[#allocation19_spill]] (!%p654_p9) }
  0x28   : > { %s3576_s29 = scalar_select %p723_p10, %s3547_s5, 1  ;;  %vm734_vm0 = vcmask 261120   ;;  %v3405_v2 = vmov 32.0   ;;  %vm1190_vm5 = vcmask 64512   ;;  %vm1322_vm6 = vcmask 1043456  }
  0x29   : > { %3259 = vrcp.f32 %v3405_v2  ;;  %v3113_v14 = vld [vmem:[%s4175_s1 + $0x8] sm:$0xff]  ;;  %v3115_v15 = vld [vmem:[%s4175_s1 + $0x18] sm:$0xff]  ;;  %v3112_v18 = vld [vmem:[%s4175_s1] sm:$0xff]  ;;  %s4183_s9 = sld [smem:[#allocation23_spill]]  ;;  %vm1608_vm10 = vcmask 523264  }
  0x2a   : > { %s2723_s3 = sshll.u32 %s3576_s29, 3  ;;  %v3117_v16 = vld [vmem:[%s4175_s1 + $0x28] sm:$0xff]  ;;  %v3119_v17 = vld [vmem:[%s4175_s1 + $0x38] sm:$0xff]  ;;  %829 = vmatpush.bf16.msra.mxu0 %v3113_v14  ;;  %854 = vmatpush.bf16.msra.mxu1 %v3115_v15  ;;  %v3114_v19 = vld [vmem:[%s4175_s1 + $0x10] sm:$0xff]  ;;  %s4177_s28 = smov %s4176_s25 }
  0x2b   : > { %s726_s6 = scalar_lea.vmem %s4174_s2, %s2723_s3  ;;  %879 = vmatpush.bf16.msra.mxu2 %v3117_v16  ;;  %904 = vmatpush.bf16.msra.mxu3 %v3119_v17  ;;  %v3116_v20 = vld [vmem:[%s4175_s1 + $0x20] sm:$0xff]  ;;  %v3118_v21 = vld [vmem:[%s4175_s1 + $0x30] sm:$0xff]  ;;  %v3121_v23 = vld [vmem:[%s4176_s25 + $0x8] sm:$0xff]  ;;  %s4184_s0 = sld [smem:[#allocation15_spill]] }
  0x2c   : > { %v731_v0 = vld [vmem:[%s726_s6] sm:$0xff]  ;;  %v3123_v24 = vld [vmem:[%s4177_s28 + $0x18] sm:$0xff]  ;;  %v3125_v25 = vld [vmem:[%s4177_s28 + $0x28] sm:$0xff]  ;;  %s4178_s6 = sld [smem:[#allocation16_spill]]  ;;  %s3109_s3 = sshll.u32 %s3547_s5, 3 }
  0x2d   : > { %v735_v1 = vsel %vm734_vm0, %v731_v0, 0.0  ;;  %v3127_v27 = vld [vmem:[%s4177_s28 + $0x38] sm:$0xff]  ;;  %v3120_v28 = vld [vmem:[%s4177_s28] sm:$0xff]  ;;  %v3122_v29 = vld [vmem:[%s4177_s28 + $0x10] sm:$0xff]  ;;  %s4185_s10 = sld [smem:[#allocation24_spill]]  ;;  %s2604_s2 = scalar_lea.hbm %s4137_s22, %s3109_s3 }
  0x2e   : > { %736 = vadd.xlane.f32.xlu0 %v735_v1  ;;  %830 = vmatpush.bf16.msra.mxu0 %v3112_v18  ;;  %v3124_v31 = vld [vmem:[%s4177_s28 + $0x20] sm:$0xff]  ;;  %v3126_v32 = vld [vmem:[%s4177_s28 + $0x30] sm:$0xff]  ;;  %v3129_v46 = vld [vmem:[%s4180_s8 + $0x8] sm:$0xff]  ;;  %s4186_s11 = sld [smem:[#allocation25_spill]]  ;;  %s2608_s27 = sshll.u32 %s2604_s2, 4  ;;  %s2609_s27 = int_to_ptr.hbm [resolvable:$true] %s2608_s27 }
  0x2f   : > { %v3260_v3 = vpop.eup %3259  ;;  %855 = vmatpush.bf16.msra.mxu1 %v3114_v19  ;;  %880 = vmatpush.bf16.msra.mxu2 %v3116_v20  ;;  %v3220_v41 = vld [vmem:[%s4179_s26] ss:$0 sm:$0xff]  ;;  %v3131_v47 = vld [vmem:[%s4180_s8 + $0x18] sm:$0xff]  ;;  %v3133_v48 = vld [vmem:[%s4180_s8 + $0x28] sm:$0xff] }
  0x30   : > { %v739_v4 = vmul.f32 32.0, %v3260_v3  ;;  %vm743_vm1 = vweird.f32 %v3260_v3  ;;  %905 = vmatpush.bf16.msra.mxu3 %v3118_v21  ;;  %v3135_v49 = vld [vmem:[%s4180_s8 + $0x38] sm:$0xff]  ;;  %v3128_v50 = vld [vmem:[%s4180_s8] sm:$0xff]  ;;  %v3130_v51 = vld [vmem:[%s4180_s8 + $0x10] sm:$0xff] }
  0x31   : > { %v3132_v52 = vld [vmem:[%s4180_s8 + $0x20] sm:$0xff]  ;;  %v3134_v53 = vld [vmem:[%s4180_s8 + $0x30] sm:$0xff]  ;;  %s729_s21 = scalar_lea.vmem %s4184_s0, %s3576_s29  ;;  %s4053_s29 = sand.u32 1, %s3395_s30  }
  0x32   : > { %v740_v5 = vsub.f32 1.0, %v739_v4  ;;  %961 = vmatpush.bf16.msrb.mxu0 %v3121_v23  ;;  %v3219_v39 = vld [vmem:[%s4178_s6] ss:$0 sm:$0xff]  ;;  %s4181_s6 = sld [smem:[#allocation21_spill]]  ;;  %v3222_v1 = vld [vmem:[%s4182_s23 + $0x1] ss:$0 sm:$0xff] }
  0x33   : > { %986 = vmatpush.bf16.msrb.mxu1 %v3123_v24  ;;  %1011 = vmatpush.bf16.msrb.mxu2 %v3125_v25  ;;  %v3223_v15 = vld [vmem:[%s4182_s23 + $0x2] ss:$0 sm:$0xff]  ;;  %v3224_v16 = vld [vmem:[%s4182_s23 + $0x3] ss:$0 sm:$0xff]  ;;  %s2722_s4 = sshll.u32 %s4053_s29, 3  ;;  %s2590_s26 = scalar_lea.sflag [#allocation3], %s4053_s29 }
  0x34   : > { %v741_v6 = vmul.f32 %v3260_v3, %v740_v5  ;;  %1036 = vmatpush.bf16.msrb.mxu3 %v3127_v27  ;;  %s716_s25 = scalar_lea.vmem [#allocation2], %s2722_s4 }
  0x35   : > { %s2606_s24 = sshll.u32 %s716_s25, 4  ;;  %s2607_s24 = int_to_ptr.vmem [resolvable:$true] %s2606_s24 }
  0x36   : > { %v742_v7 = vadd.f32 %v3260_v3, %v741_v6  ;;  %962 = vmatpush.bf16.msrb.mxu0 %v3120_v28 }
  0x37   : > { %987 = vmatpush.bf16.msrb.mxu1 %v3122_v29  ;;  %1012 = vmatpush.bf16.msrb.mxu2 %v3124_v31 }
  0x38   : > { %v3583_v8 = vsel %vm743_vm1, %v3260_v3, %v742_v7  ;;  %1037 = vmatpush.bf16.msrb.mxu3 %v3126_v32  ;;  %v3225_v60 = vld [vmem:[%s4181_s6] ss:$0 sm:$0xff]  ;;  %v3226_v61 = vld [vmem:[%s4181_s6 + $0x1] ss:$0 sm:$0xff] }
  0xa1   : > { %v737_v9 = vpop.xlane.xlu0 %736 }
  0xa2   : > { %v745_v10 = vmul.f32 %v3583_v8, %v737_v9 }
  0xa4   : > { %v746_v11 = vsub.f32 %v731_v0, %v745_v10  ;;  %v3221_v0 = vld [vmem:[%s4182_s23] ss:$0 sm:$0xff] }
  0xa6   : > { %v747_v12 = vmul.f32 %v746_v11, %v746_v11 }
  0xa8   : > { %v748_v13 = vsel %vm734_vm0, %v747_v12, 0.0  ;;  %v3228_v12 = vld [vmem:[%s4181_s6 + $0x3] ss:$0 sm:$0xff] }
  0xa9   : > { %749 = vadd.xlane.f32.xlu0 %v748_v13 }
 0x11c   : > { %v750_v22 = vpop.xlane.xlu0 %749 }
 0x11d   : > { %v751_v26 = vmul.f32 %v750_v22, %v3583_v8 }
 0x11f   : > { %v752_v30 = vadd.f32 1e-12, %v751_v26 }
 0x121   : > { %3261 = vrsqrt.f32 %v752_v30  ;;  %vm759_vm3 = vweird.f32 %v752_v30 }
 0x127   : > { %v3262_v33 = vpop.eup %3261 }
 0x128   : > { %v754_v34 = vmul.f32 %v3262_v33, %v752_v30  ;;  %vm760_vm2 = vweird.f32 %v3262_v33 }
 0x129   : > { %vm761_vm4 = vmor %vm759_vm3, %vm760_vm2 }
 0x12a   : > { %v755_v35 = vmul.f32 %v3262_v33, %v754_v34  ;;  %v3230_v34 = vld [vmem:[%s4183_s9 + $0x1] ss:$0 sm:$0xff] }
 0x12c   : > { %v756_v36 = vmul.f32 0.5, %v755_v35 }
 0x12e   : > { %v757_v37 = vsub.f32 1.5, %v756_v36 }
 0x130   : > { %v758_v38 = vmul.f32 %v3262_v33, %v757_v37 }
 0x132   : > { %v762_v40 = vsel %vm761_vm4, %v3262_v33, %v758_v38  ;;  %v3229_v33 = vld [vmem:[%s4183_s9] ss:$0 sm:$0xff] }
 0x133   : > { %v763_v42 = vmul.f32 %v762_v40, %v746_v11  ;;  %v3227_v11 = vld [vmem:[%s4181_s6 + $0x2] ss:$0 sm:$0xff] }
 0x135   : > { %v767_v43 = vmul.f32 %v3219_v39, %v763_v42 }
 0x137   : > { %v3642_v44 = vadd.f32 %v3220_v41, %v767_v43 }
 0x139   : > { %v775_v45 = vpack.c.bf16 %v3642_v44, %v3642_v44 }
 0x13b   : > { %2732 = vmatmul.msk.bf16.vlgmr.msra.gmra.mxu0 %vm734_vm0, %v775_v45  ;;  %2741 = vmatmul.msk.bf16.vlgmr.msra.gmra.mxu1 %vm734_vm0, %v775_v45 }
 0x13c   : > { %2750 = vmatmul.msk.bf16.vlgmr.msra.gmra.mxu2 %vm734_vm0, %v775_v45  ;;  %2759 = vmatmul.msk.bf16.vlgmr.msra.gmra.mxu3 %vm734_vm0, %v775_v45 }
 0x13d   : > { %1093 = vmatpush.bf16.msra.mxu0 %v3129_v46  ;;  %1118 = vmatpush.bf16.msra.mxu1 %v3131_v47 }
 0x13e   : > { %1143 = vmatpush.bf16.msra.mxu2 %v3133_v48  ;;  %1168 = vmatpush.bf16.msra.mxu3 %v3135_v49  ;;  %v3231_v48 = vld [vmem:[%s4183_s9 + $0x2] ss:$0 sm:$0xff]  ;;  %v3232_v49 = vld [vmem:[%s4183_s9 + $0x3] ss:$0 sm:$0xff] }
 0x141   : > { %1094 = vmatpush.bf16.msra.mxu0 %v3128_v50  ;;  %1119 = vmatpush.bf16.msra.mxu1 %v3130_v51 }
 0x142   : > { %1144 = vmatpush.bf16.msra.mxu2 %v3132_v52  ;;  %1169 = vmatpush.bf16.msra.mxu3 %v3134_v53 }
 0x14b   : > { %2768 = vmatmul.msk.bf16.vlgmr.msrb.gmra.mxu0 %vm734_vm0, %v775_v45  ;;  %2777 = vmatmul.msk.bf16.vlgmr.msrb.gmra.mxu1 %vm734_vm0, %v775_v45 }
 0x14c   : > { %2786 = vmatmul.msk.bf16.vlgmr.msrb.gmra.mxu2 %vm734_vm0, %v775_v45  ;;  %2795 = vmatmul.msk.bf16.vlgmr.msrb.gmra.mxu3 %vm734_vm0, %v775_v45 }
 0x15b   : > { %2804 = vmatmul.msk.bf16.vlgmr.msra.gmra.mxu0 %vm734_vm0, %v775_v45  ;;  %2813 = vmatmul.msk.bf16.vlgmr.msra.gmra.mxu1 %vm734_vm0, %v775_v45 }
 0x15c   : > { %2822 = vmatmul.msk.bf16.vlgmr.msra.gmra.mxu2 %vm734_vm0, %v775_v45  ;;  %2831 = vmatmul.msk.bf16.vlgmr.msra.gmra.mxu3 %vm734_vm0, %v775_v45 }
 0x1b8   : > { %v832_v54 = vpop.f32.mrf.mxu0  ;;  %v857_v55 = vpop.f32.mrf.mxu1 }
 0x1b9   : > { %v833_v9 = vadd.f32 %v3221_v0, %v832_v54  ;;  %v858_v10 = vadd.f32 %v3222_v1, %v857_v55  ;;  %v772_v0 = vld [vmem:[%s729_s21] sm:$0x1] }
 0x1ba   : > { %v773_v1 = vsub.f32 1.0, %v772_v0  ;;  %v1403_v0 = vld [vmem:[%s4185_s10 + $0xc] sm:$0xf] }
 0x1bb   : > { %v1175_v19 = vmul.f32 0.35355338, %v833_v9  ;;  %v1176_v20 = vmul.f32 0.35355338, %v858_v10 }
 0x1bd   : > { %v1179_v29 = vpack.c.bf16 %v1175_v19, %v1175_v19  ;;  %v1180_v30 = vpack.c.bf16 %v1176_v20, %v1176_v20 }
 0x1bf   : > { %v882_v56 = vpop.f32.mrf.mxu2  ;;  %v907_v57 = vpop.f32.mrf.mxu3 }
 0x1c0   : > { %v834_v58 = vpop.f32.mrf.mxu0  ;;  %v859_v59 = vpop.f32.mrf.mxu1  ;;  %v883_v25 = vadd.f32 %v3223_v15, %v882_v56  ;;  %v908_v26 = vadd.f32 %v3224_v16, %v907_v57 }
 0x1c2   : > { %v1177_v35 = vmul.f32 0.35355338, %v883_v25  ;;  %v1178_v36 = vmul.f32 0.35355338, %v908_v26 }
 0x1c4   : > { %v1181_v43 = vpack.c.bf16 %v1177_v35, %v1177_v35  ;;  %v1182_v45 = vpack.c.bf16 %v1178_v36, %v1178_v36 }
 0x1c7   : > { %v884_v62 = vpop.f32.mrf.mxu2  ;;  %v909_v63 = vpop.f32.mrf.mxu3 }
 0x1c8   : > { %v964_v2 = vpop.f32.mrf.mxu0  ;;  %v989_v3 = vpop.f32.mrf.mxu1 }
 0x1c9   : > { %v965_v4 = vadd.f32 %v3225_v60, %v964_v2  ;;  %v990_v5 = vadd.f32 %v3226_v61, %v989_v3  ;;  %v774_v2 = vmul.f32 -10000.0, %v773_v1  ;;  %v1465_v1 = vsel %vm1322_vm6, %v1403_v0, 0 }
 0x1cb   : > { %v1183_v6 = vpack.c.bf16 %v965_v4, %v965_v4  ;;  %v1184_v7 = vpack.c.bf16 %v990_v5, %v990_v5  ;;  %v3734_v3 = vperm.slane %v774_v2, 0 }
 0x1cd   : > { %v1195_v13 = vsel %vm1190_vm5, %v1183_v6, 0  ;;  %v1214_v14 = vsel %vm1190_vm5, %v1184_v7, 0 }
 0x1ce   : > { %1204 = vmatpush.bf16.xpose.msrb.mxu0 %v1195_v13  ;;  %1223 = vmatpush.bf16.xpose.msrb.mxu1 %v1214_v14 }
 0x1cf   : > { %v1014_v17 = vpop.f32.mrf.mxu2  ;;  %v1039_v18 = vpop.f32.mrf.mxu3 }
 0x1d0   : > { %v1015_v21 = vadd.f32 %v3227_v11, %v1014_v17  ;;  %v1040_v22 = vadd.f32 %v3228_v12, %v1039_v18  ;;  %v966_v23 = vpop.f32.mrf.mxu0  ;;  %v991_v24 = vpop.f32.mrf.mxu1 }
 0x1d2   : > { %v1185_v27 = vpack.c.bf16 %v1015_v21, %v1015_v21  ;;  %v1186_v28 = vpack.c.bf16 %v1040_v22, %v1040_v22 }
 0x1d4   : > { %v1233_v31 = vsel %vm1190_vm5, %v1185_v27, 0  ;;  %v1252_v32 = vsel %vm1190_vm5, %v1186_v28, 0 }
 0x1d5   : > { %1242 = vmatpush.bf16.xpose.msrb.mxu2 %v1233_v31  ;;  %1261 = vmatpush.bf16.xpose.msrb.mxu3 %v1252_v32 }
 0x1d6   : > { %2832 = vmatmul.msk.bf16.vlgmr.msrb.gmra.mxu0 %vm1190_vm5, %v1179_v29  ;;  %2833 = vmatmul.msk.bf16.vlgmr.msrb.gmra.mxu1 %vm1190_vm5, %v1180_v30 }
 0x1d7   : > { %v1016_v37 = vpop.f32.mrf.mxu2  ;;  %v1041_v38 = vpop.f32.mrf.mxu3 }
 0x1d8   : > { %v1096_v39 = vpop.f32.mrf.mxu0  ;;  %v1121_v40 = vpop.f32.mrf.mxu1 }
 0x1d9   : > { %v1097_v41 = vadd.f32 %v3229_v33, %v1096_v39  ;;  %v1122_v42 = vadd.f32 %v3230_v34, %v1121_v40 }
 0x1db   : > { %v1315_v46 = vpack.c.bf16 %v1097_v41, %v1097_v41  ;;  %v1316_v47 = vpack.c.bf16 %v1122_v42, %v1122_v42 }
 0x1dc   : > { %2834 = vmatmul.msk.bf16.vlgmr.msrb.gmra.mxu2 %vm1190_vm5, %v1181_v43  ;;  %2835 = vmatmul.msk.bf16.vlgmr.msrb.gmra.mxu3 %vm1190_vm5, %v1182_v45 }
 0x1dd   : > { %v1324_v50 = vsel %vm1322_vm6, %v1315_v46, 0  ;;  %v1343_v51 = vsel %vm1322_vm6, %v1316_v47, 0 }
 0x1de   : > { %1333 = vmatpush.bf16.msra.mxu0 %v1324_v50  ;;  %1352 = vmatpush.bf16.msra.mxu1 %v1343_v51 }
 0x1df   : > { %v1146_v52 = vpop.f32.mrf.mxu2  ;;  %v1171_v53 = vpop.f32.mrf.mxu3 }
 0x1e0   : > { %v1147_v54 = vadd.f32 %v3231_v48, %v1146_v52  ;;  %v1172_v55 = vadd.f32 %v3232_v49, %v1171_v53  ;;  %v1098_v56 = vpop.f32.mrf.mxu0  ;;  %v1123_v57 = vpop.f32.mrf.mxu1 }
 0x1e2   : > { %v1317_v58 = vpack.c.bf16 %v1147_v54, %v1147_v54  ;;  %v1318_v59 = vpack.c.bf16 %v1172_v55, %v1172_v55 }
 0x1e4   : > { %v1362_v60 = vsel %vm1322_vm6, %v1317_v58, 0  ;;  %v1381_v61 = vsel %vm1322_vm6, %v1318_v59, 0  ;;  %v1400_v58 = vld [vmem:[%s4185_s10] sm:$0xf] }
 0x1e5   : > { %1371 = vmatpush.bf16.msra.mxu2 %v1362_v60  ;;  %1390 = vmatpush.bf16.msra.mxu3 %v1381_v61  ;;  %v1408_v59 = vsel %vm1322_vm6, %v1400_v58, 0  ;;  %v1402_v60 = vld [vmem:[%s4185_s10 + $0x8] sm:$0xf]  ;;  %v3141_v58 = vld [vmem:[%s4131_s16 + $0x18] sm:$0xff] }
 0x1e6   : > { %1417 = vmatpush.bf16.msrb.mxu0 %v1408_v59  ;;  %v1446_v61 = vsel %vm1322_vm6, %v1402_v60, 0  ;;  %v3140_v59 = vld [vmem:[%s4131_s16 + $0x10] sm:$0xff]  ;;  %v3139_v60 = vld [vmem:[%s4131_s16 + $0x8] sm:$0xff] }
 0x1e7   : > { %v1148_v62 = vpop.f32.mrf.mxu2  ;;  %v1173_v63 = vpop.f32.mrf.mxu3 }
 0x1e8   : > { %v1401_v62 = vld [vmem:[%s4185_s10 + $0x4] sm:$0xf] }
 0x1e9   : > { %1455 = vmatpush.bf16.msrb.mxu2 %v1446_v61  ;;  %v1427_v63 = vsel %vm1322_vm6, %v1401_v62, 0  ;;  %1474 = vmatpush.bf16.msrb.mxu3 %v1465_v1  ;;  %v3138_v61 = vld [vmem:[%s4131_s16] sm:$0xff] }
 0x1ea   : > { %1436 = vmatpush.bf16.msrb.mxu1 %v1427_v63  ;;  %v3236_v62 = vld [vmem:[%s4130_s15] ss:$0 sm:$0xff] }
 0x253   : > { %v1206_v4 = vpop.f32.mrf.mxu0  ;;  %v1225_v5 = vpop.f32.mrf.mxu1 }
 0x254   : > { %v1207_v6 = vadd.f32 %v1206_v4, %v3734_v3  ;;  %v1226_v9 = vadd.f32 %v1225_v5, %v3734_v3 }
 0x256   : > { %v1267_v7 = vsel %vm1190_vm5, %v1207_v6, -inf  ;;  %v1270_v12 = vsel %vm1190_vm5, %v1226_v9, -inf }
 0x257   : > { %1268 = vmax.xlane.f32.xlu2 %v1267_v7 }
 0x25b   : > { %v1208_v10 = vpop.f32.mrf.mxu0  ;;  %v1227_v11 = vpop.f32.mrf.mxu1 }
 0x25f   : > { %v1244_v13 = vpop.f32.mrf.mxu2  ;;  %v1263_v14 = vpop.f32.mrf.mxu3  ;;  %1271 = vmax.xlane.f32.xlu2 %v1270_v12 }
 0x260   : > { %v1245_v15 = vadd.f32 %v1244_v13, %v3734_v3  ;;  %v1264_v17 = vadd.f32 %v1263_v14, %v3734_v3 }
 0x262   : > { %v1273_v16 = vsel %vm1190_vm5, %v1245_v15, -inf  ;;  %v1276_v20 = vsel %vm1190_vm5, %v1264_v17, -inf }
 0x263   : > { %1274 = vmax.xlane.f32.xlu1 %v1273_v16 }
 0x267   : > { %v1246_v18 = vpop.f32.mrf.mxu2  ;;  %v1265_v19 = vpop.f32.mrf.mxu3 }
 0x26b   : > { %1277 = vmax.xlane.f32.xlu1 %v1276_v20 }
 0x2ca   : > { %v1269_v21 = vpop.xlane.xlu2 %1268 }
 0x2cb   : > { %v1279_v22 = vsub.f32 %v1207_v6, %v1269_v21 }
 0x2cd   : > { %v1283_v23 = vmul.f32 1.442695, %v1279_v22 }
 0x2cf   : > { %3263 = vpow2.f32 %v1283_v23 }
 0x2d2   : > { %v1272_v25 = vpop.xlane.xlu2 %1271 }
 0x2d3   : > { %v1280_v29 = vsub.f32 %v1226_v9, %v1272_v25 }
 0x2d5   : > { %v3264_v24 = vpop.eup %3263  ;;  %v1285_v31 = vmul.f32 1.442695, %v1280_v29 }
 0x2d6   : > { %v1275_v26 = vpop.xlane.xlu1 %1274  ;;  %v1291_v27 = vsel %vm1190_vm5, %v3264_v24, 0.0 }
 0x2d7   : > { %v1281_v28 = vsub.f32 %v1245_v15, %v1275_v26  ;;  %1292 = vadd.xlane.f32.xlu2 %v1291_v27 }
 0x2d9   : > { %v1287_v30 = vmul.f32 1.442695, %v1281_v28  ;;  %v3233_v28 = vld [vmem:[%s4186_s11] ss:$0 sm:$0xff] }
 0x2db   : > { %3265 = vpow2.f32 %v1287_v30 }
 0x2dc   : > { %3267 = vpow2.f32 %v1285_v31 }
 0x2de   : > { %v1278_v32 = vpop.xlane.xlu1 %1277 }
 0x2df   : > { %v1282_v33 = vsub.f32 %v1264_v17, %v1278_v32 }
 0x2e1   : > { %v3266_v34 = vpop.eup %3265  ;;  %v1289_v35 = vmul.f32 1.442695, %v1282_v33 }
 0x2e2   : > { %v1297_v36 = vsel %vm1190_vm5, %v3266_v34, 0.0  ;;  %v3268_v37 = vpop.eup %3267 }
 0x2e3   : > { %3269 = vpow2.f32 %v1289_v35  ;;  %1298 = vadd.xlane.f32.xlu0 %v1297_v36  ;;  %v1294_v40 = vsel %vm1190_vm5, %v3268_v37, 0.0 }
 0x2e9   : > { %v3270_v38 = vpop.eup %3269 }
 0x2ea   : > { %v1300_v39 = vsel %vm1190_vm5, %v3270_v38, 0.0 }
 0x2eb   : > { %1301 = vadd.xlane.f32.xlu1 %v1300_v39  ;;  %1295 = vadd.xlane.f32.xlu0 %v1294_v40  ;;  %v3137_v40 = vld [vmem:[%s4129_s14 + $0x8] sm:$0xff] }
 0x34a   : > { %v1293_v41 = vpop.xlane.xlu2 %1292 }
 0x34b   : > { %3271 = vrcp.f32 %v1293_v41 }
 0x351   : > { %v3272_v42 = vpop.eup %3271 }
 0x352   : > { %v1307_v43 = vmul.f32 %v3272_v42, %v3264_v24 }
 0x354   : > { %v1311_v45 = vpack.c.bf16 %v1307_v43, %v1307_v43 }
 0x356   : > { %v1299_v46 = vpop.xlane.xlu0 %1298  ;;  %2836 = vmatmul.msk.bf16.vlgmr.msra.gmra.mxu0 %vm1190_vm5, %v1311_v45 }
 0x357   : > { %3273 = vrcp.f32 %v1299_v46  ;;  %1555 = vmatpush.bf16.msra.mxu0 %v3137_v40  ;;  %v3152_v40 = vld [vmem:[%s4177_s28 + $0x50] sm:$0xff] }
 0x35d   : > { %v3274_v47 = vpop.eup %3273 }
 0x35e   : > { %v1309_v48 = vmul.f32 %v3274_v47, %v3266_v34  ;;  %v1302_v49 = vpop.xlane.xlu1 %1301  ;;  %v1296_v50 = vpop.xlane.xlu0 %1295 }
 0x35f   : > { %3275 = vrcp.f32 %v1302_v49 }
 0x360   : > { %v1313_v51 = vpack.c.bf16 %v1309_v48, %v1309_v48  ;;  %3277 = vrcp.f32 %v1296_v50 }
 0x362   : > { %2838 = vmatmul.msk.bf16.vlgmr.msra.gmra.mxu2 %vm1190_vm5, %v1313_v51  ;;  %v3234_v51 = vld [vmem:[%s4127_s12] ss:$0 sm:$0xff] }
 0x365   : > { %v3276_v52 = vpop.eup %3275 }
 0x366   : > { %v3278_v53 = vpop.eup %3277  ;;  %v1310_v54 = vmul.f32 %v3276_v52, %v3270_v38 }
 0x367   : > { %v1308_v55 = vmul.f32 %v3278_v53, %v3268_v37  ;;  %v3235_v53 = vld [vmem:[%s4128_s13] ss:$0 sm:$0xff] }
 0x368   : > { %v1314_v56 = vpack.c.bf16 %v1310_v54, %v1310_v54 }
 0x369   : > { %v1312_v57 = vpack.c.bf16 %v1308_v55, %v1308_v55 }
 0x36a   : > { %2839 = vmatmul.msk.bf16.vlgmr.msra.gmra.mxu3 %vm1190_vm5, %v1314_v56 }
 0x36b   : > { %2837 = vmatmul.msk.bf16.vlgmr.msra.gmra.mxu1 %vm1190_vm5, %v1312_v57 }
 0x36c   : > { %1616 = vmatpush.bf16.msra.mxu1 %v3141_v58  ;;  %v3161_v58 = vld [vmem:[%s4180_s8 + $0x58] sm:$0xff] }
 0x370   : > { %1617 = vmatpush.bf16.msra.mxu1 %v3140_v59  ;;  %v3163_v59 = vld [vmem:[%s4180_s8 + $0x68] sm:$0xff] }
 0x374   : > { %1618 = vmatpush.bf16.msra.mxu1 %v3139_v60  ;;  %v3165_v60 = vld [vmem:[%s4180_s8 + $0x78] sm:$0xff] }
 0x378   : > { %1619 = vmatpush.bf16.msra.mxu1 %v3138_v61  ;;  %v3158_v61 = vld [vmem:[%s4180_s8 + $0x40] sm:$0xff] }
 0x3d3   : > { %v1335_v2 = vpop.f32.mrf.mxu0 }
 0x3d4   : > { %v1396_v4 = vpack.c.bf16 %v1335_v2, %v1335_v2 }
 0x3d6   : > { %2840 = vmatmul.msk.bf16.vlgmr.msrb.gmra.mxu0 %vm1190_vm5, %v1396_v4 }
 0x3db   : > { %v1337_v5 = vpop.f32.mrf.mxu0 }
 0x3e5   : > { %v1373_v6 = vpop.f32.mrf.mxu2 }
 0x3e6   : > { %v1398_v7 = vpack.c.bf16 %v1373_v6, %v1373_v6 }
 0x3e8   : > { %v1354_v9 = vpop.f32.mrf.mxu1  ;;  %2842 = vmatmul.msk.bf16.vlgmr.msrb.gmra.mxu2 %vm1190_vm5, %v1398_v7 }
 0x3e9   : > { %v1397_v10 = vpack.c.bf16 %v1354_v9, %v1354_v9 }
 0x3eb   : > { %2841 = vmatmul.msk.bf16.vlgmr.msrb.gmra.mxu1 %vm1190_vm5, %v1397_v10 }
 0x3ed   : > { %v1375_v11 = vpop.f32.mrf.mxu2  ;;  %v1392_v12 = vpop.f32.mrf.mxu3 }
 0x3ee   : > { %v1399_v13 = vpack.c.bf16 %v1392_v12, %v1392_v12 }
 0x3f0   : > { %v1356_v14 = vpop.f32.mrf.mxu1  ;;  %2843 = vmatmul.msk.bf16.vlgmr.msrb.gmra.mxu3 %vm1190_vm5, %v1399_v13 }
 0x3f1   : > { %v3237_v14 = vld [vmem:[%s4132_s17] ss:$0 sm:$0xff] }
 0x3f5   : > { %v1394_v15 = vpop.f32.mrf.mxu3 }
 0x453   : > { %v1419_v16 = vpop.f32.mrf.mxu0 }
 0x454   : > { %v1480_v21 = vsel %vm734_vm0, %v1419_v16, 0.0 }
 0x45b   : > { %v1421_v17 = vpop.f32.mrf.mxu0 }
 0x468   : > { %v1438_v18 = vpop.f32.mrf.mxu1 }
 0x469   : > { %v1481_v20 = vsel %vm734_vm0, %v1438_v18, 0.0 }
 0x46a   : > { %v1482_v24 = vadd.f32 %v1481_v20, %v1480_v21 }
 0x46b   : > { %v1457_v19 = vpop.f32.mrf.mxu2 }
 0x46c   : > { %v1483_v22 = vsel %vm734_vm0, %v1457_v19, 0.0 }
 0x46d   : > { %v1484_v25 = vadd.f32 %v1483_v22, %v1482_v24 }
 0x470   : > { %v1440_v23 = vpop.f32.mrf.mxu1 }
 0x473   : > { %v1459_v26 = vpop.f32.mrf.mxu2  ;;  %v1476_v27 = vpop.f32.mrf.mxu3 }
 0x474   : > { %v1485_v29 = vsel %vm734_vm0, %v1476_v27, 0.0  ;;  %v3145_v26 = vld [vmem:[%s4175_s1 + $0x58] sm:$0xff]  ;;  %v3147_v27 = vld [vmem:[%s4175_s1 + $0x68] sm:$0xff] }
 0x475   : > { %v1486_v30 = vadd.f32 %v1485_v29, %v1484_v25  ;;  %v3143_v25 = vld [vmem:[%s4175_s1 + $0x48] sm:$0xff]  ;;  %1739 = vmatpush.bf16.msra.mxu3 %v3145_v26  ;;  %v3142_v29 = vld [vmem:[%s4175_s1 + $0x40] sm:$0xff] }
 0x476   : > { %1714 = vmatpush.bf16.msra.mxu2 %v3143_v25  ;;  %v3242_v25 = vld [vmem:[%s4182_s23 + $0x4] ss:$0 sm:$0xff]  ;;  %v3243_v26 = vld [vmem:[%s4182_s23 + $0x5] ss:$0 sm:$0xff] }
 0x477   : > { %v1491_v31 = vadd.f32 %v3233_v28, %v1486_v30  ;;  %v3149_v28 = vld [vmem:[%s4175_s1 + $0x78] sm:$0xff]  ;;  %v3144_v30 = vld [vmem:[%s4175_s1 + $0x50] sm:$0xff] }
 0x478   : > { %1789 = vmatpush.bf16.msrb.mxu1 %v3149_v28 }
 0x479   : > { %v1492_v32 = vadd.f32 %v1491_v31, %v3642_v44  ;;  %v3136_v44 = vld [vmem:[%s4129_s14] sm:$0xff]  ;;  %1740 = vmatpush.bf16.msra.mxu3 %v3144_v30 }
 0x47a   : > { %1556 = vmatpush.bf16.msra.mxu0 %v3136_v44  ;;  %v3146_v31 = vld [vmem:[%s4175_s1 + $0x60] sm:$0xff]  ;;  %1715 = vmatpush.bf16.msra.mxu2 %v3142_v29 }
 0x47b   : > { %v1478_v33 = vpop.f32.mrf.mxu3  ;;  %v1495_v34 = vsel %vm734_vm0, %v1492_v32, 0.0 }
 0x47c   : > { %1496 = vadd.xlane.f32.xlu1 %v1495_v34  ;;  %v3151_v34 = vld [vmem:[%s4177_s28 + $0x48] sm:$0xff] }
 0x47e   : > { %1764 = vmatpush.bf16.msrb.mxu0 %v3147_v27  ;;  %1848 = vmatpush.bf16.msrb.mxu2 %v3151_v34 }
 0x482   : > { %1765 = vmatpush.bf16.msrb.mxu0 %v3146_v31 }
 0x4ef   : > { %v1497_v35 = vpop.xlane.xlu1 %1496 }
 0x4f0   : > { %v1498_v36 = vmul.f32 %v1497_v35, %v3583_v8  ;;  %v3153_v35 = vld [vmem:[%s4177_s28 + $0x58] sm:$0xff] }
 0x4f1   : > { %1873 = vmatpush.bf16.msrb.mxu3 %v3153_v35 }
 0x4f2   : > { %v1499_v37 = vsub.f32 %v1492_v32, %v1498_v36  ;;  %v3148_v32 = vld [vmem:[%s4175_s1 + $0x70] sm:$0xff]  ;;  %v3155_v36 = vld [vmem:[%s4177_s28 + $0x68] sm:$0xff]  ;;  %s3323_s1 = sshra.s32 %s2609_s27, 4  ;;  %s3324_s1 = int_to_ptr.hbm [resolvable:$true] %s3323_s1 }
 0x4f3   : > { %1790 = vmatpush.bf16.msrb.mxu1 %v3148_v32  ;;  %p3330_p0 = scmp.lt.s32.totalorder %s3324_s1, %s4137_s22 }
 0x4f4   : > { %v1500_v38 = vmul.f32 %v1499_v37, %v1499_v37 }
 0x4f5   : > { %1874 = vmatpush.bf16.msrb.mxu3 %v3152_v40 }
 0x4f6   : > { %v1501_v39 = vsel %vm734_vm0, %v1500_v38, 0.0  ;;  %v3157_v38 = vld [vmem:[%s4177_s28 + $0x78] sm:$0xff] }
 0x4f7   : > { %1502 = vadd.xlane.f32.xlu2 %v1501_v39  ;;  %v3150_v39 = vld [vmem:[%s4177_s28 + $0x40] sm:$0xff] }
 0x4f8   : > { %1849 = vmatpush.bf16.msrb.mxu2 %v3150_v39 }
 0x56a   : > { %v1503_v41 = vpop.xlane.xlu2 %1502 }
 0x56b   : > { %v1504_v42 = vmul.f32 %v1503_v41, %v3583_v8  ;;  %v3154_v41 = vld [vmem:[%s4177_s28 + $0x60] sm:$0xff] }
 0x56d   : > { %v1505_v43 = vadd.f32 1e-12, %v1504_v42  ;;  %v3156_v42 = vld [vmem:[%s4177_s28 + $0x70] sm:$0xff] }
 0x56f   : > { %3279 = vrsqrt.f32 %v1505_v43  ;;  %vm1512_vm8 = vweird.f32 %v1505_v43 }
 0x575   : > { %v3280_v45 = vpop.eup %3279 }
 0x576   : > { %v1507_v46 = vmul.f32 %v3280_v45, %v1505_v43  ;;  %vm1513_vm7 = vweird.f32 %v3280_v45 }
 0x577   : > { %vm1514_vm9 = vmor %vm1512_vm8, %vm1513_vm7 }
 0x578   : > { %v1508_v47 = vmul.f32 %v3280_v45, %v1507_v46 }
 0x57a   : > { %v1509_v48 = vmul.f32 0.5, %v1508_v47 }
 0x57c   : > { %v1510_v49 = vsub.f32 1.5, %v1509_v48 }
 0x57e   : > { %v1511_v50 = vmul.f32 %v3280_v45, %v1510_v49 }
 0x580   : > { %v1515_v52 = vsel %vm1514_vm9, %v3280_v45, %v1511_v50  ;;  %v3238_v50 = vld [vmem:[%s4133_s18] ss:$0 sm:$0xff] }
 0x581   : > { %v1516_v54 = vmul.f32 %v1515_v52, %v1499_v37  ;;  %v3239_v52 = vld [vmem:[%s4134_s19] ss:$0 sm:$0xff] }
 0x583   : > { %v1520_v55 = vmul.f32 %v3234_v51, %v1516_v54 }
 0x585   : > { %v1524_v56 = vadd.f32 %v3235_v53, %v1520_v55 }
 0x587   : > { %v1525_v57 = vpack.c.bf16 %v1524_v56, %v1524_v56 }
 0x589   : > { %2852 = vmatmul.msk.bf16.vlgmr.msra.gmra.mxu0 %vm734_vm0, %v1525_v57  ;;  %v3159_v57 = vld [vmem:[%s4180_s8 + $0x48] sm:$0xff] }
 0x58a   : > { %1898 = vmatpush.bf16.msra.mxu0 %v3155_v36 }
 0x58e   : > { %1899 = vmatpush.bf16.msra.mxu0 %v3154_v41 }
 0x606   : > { %v1558_v63 = vpop.f32.mrf.mxu0 }
 0x607   : > { %v1559_v0 = vadd.f32 %v3236_v62, %v1558_v63  ;;  %v3160_v62 = vld [vmem:[%s4180_s8 + $0x50] sm:$0xff]  ;;  %v3162_v63 = vld [vmem:[%s4180_s8 + $0x60] sm:$0xff] }
 0x609   : > { %v1563_v1 = vmul.f32 0.044715, %v1559_v0  ;;  %v1562_v10 = vmul.f32 0.5, %v1559_v0 }
 0x60b   : > { %v1564_v2 = vmul.f32 %v1563_v1, %v1559_v0 }
 0x60d   : > { %v1565_v4 = vmul.f32 %v1564_v2, %v1559_v0 }
 0x60e   : > { %v1560_v5 = vpop.f32.mrf.mxu0 }
 0x60f   : > { %v1566_v6 = vadd.f32 %v1565_v4, %v1559_v0  ;;  %v3164_v0 = vld [vmem:[%s4180_s8 + $0x70] sm:$0xff] }
 0x611   : > { %v1567_v7 = vmul.f32 0.7978846, %v1566_v6 }
 0x613   : > { %3281 = vtanh.f32 %v1567_v7 }
 0x619   : > { %v3282_v9 = vpop.eup %3281 }
 0x61a   : > { %v1569_v11 = vadd.f32 1.0, %v3282_v9 }
 0x61c   : > { %v1570_v12 = vmul.f32 %v1569_v11, %v1562_v10  ;;  %v3244_v11 = vld [vmem:[%s4181_s6 + $0x6] ss:$0 sm:$0xff] }
 0x61e   : > { %v1571_v13 = vpack.c.bf16 %v1570_v12, %v1570_v12  ;;  %v3245_v12 = vld [vmem:[%s4181_s6 + $0x7] ss:$0 sm:$0xff] }
 0x620   : > { %2869 = vmatmul.msk.bf16.vlgmr.msra.gmra.mxu1 %vm1608_vm10, %v1571_v13  ;;  %v3240_v13 = vld [vmem:[%s4182_s23 + $0x6] ss:$0 sm:$0xff] }
 0x621   : > { %1923 = vmatpush.bf16.msra.mxu1 %v3157_v38 }
 0x625   : > { %1924 = vmatpush.bf16.msra.mxu1 %v3156_v42 }
 0x69d   : > { %v1621_v15 = vpop.f32.mrf.mxu1 }
 0x69e   : > { %v1622_v16 = vadd.f32 %v3237_v14, %v1621_v15  ;;  %v3241_v14 = vld [vmem:[%s4182_s23 + $0x7] ss:$0 sm:$0xff] }
 0x6a0   : > { %v1625_v17 = vadd.f32 %v1622_v16, %v1524_v56 }
 0x6a2   : > { %v1628_v18 = vsel %vm734_vm0, %v1625_v17, 0.0 }
 0x6a3   : > { %1629 = vadd.xlane.f32.xlu0 %v1628_v18 }
 0x6a5   : > { %v1623_v19 = vpop.f32.mrf.mxu1 }
 0x6a6   : > { %v3246_v19 = vld [vmem:[%s4181_s6 + $0x4] ss:$0 sm:$0xff] }
 0x716   : > { %v1630_v20 = vpop.xlane.xlu0 %1629 }
 0x717   : > { %v1631_v21 = vmul.f32 %v1630_v20, %v3583_v8  ;;  %v3247_v20 = vld [vmem:[%s4181_s6 + $0x5] ss:$0 sm:$0xff]  ;;  %s3325_s6 = scalar_lea.hbm %s3324_s1, 8 }
 0x718   : > { %p3326_p11 = scmp.ne.s32.totalorder %s3324_s1, %s3325_s6 }
 0x719   : > { %v1632_v22 = vsub.f32 %v1625_v17, %v1631_v21 }
 0x71a   : > { %p3327_p12 = pnand %p3326_p11, %p3564_p5 }
 0x71b   : > { %v1633_v23 = vmul.f32 %v1632_v22, %v1632_v22 }
 0x71c   : > { %p3328_p13 = pneg %p3327_p12 }
 0x71d   : > { %v1634_v24 = vsel %vm734_vm0, %v1633_v23, 0.0 }
 0x71e   : > { %1635 = vadd.xlane.f32.xlu1 %v1634_v24 }
 0x791   : > { %v1636_v33 = vpop.xlane.xlu1 %1635 }
 0x792   : > { %v1637_v37 = vmul.f32 %v1636_v33, %v3583_v8 }
 0x794   : > { %v1638_v44 = vadd.f32 1e-12, %v1637_v37 }
 0x796   : > { %3283 = vrsqrt.f32 %v1638_v44  ;;  %vm1645_vm12 = vweird.f32 %v1638_v44 }
 0x79c   : > { %v3284_v43 = vpop.eup %3283 }
 0x79d   : > { %v1640_v45 = vmul.f32 %v3284_v43, %v1638_v44  ;;  %vm1646_vm11 = vweird.f32 %v3284_v43 }
 0x79e   : > { %vm1647_vm13 = vmor %vm1645_vm12, %vm1646_vm11 }
 0x79f   : > { %v1641_v46 = vmul.f32 %v3284_v43, %v1640_v45 }
 0x7a1   : > { %v1642_v47 = vmul.f32 0.5, %v1641_v46 }
 0x7a3   : > { %v1643_v48 = vsub.f32 1.5, %v1642_v47 }
 0x7a5   : > { %v1644_v49 = vmul.f32 %v3284_v43, %v1643_v48 }
 0x7a7   : > { %v1648_v51 = vsel %vm1647_vm13, %v3284_v43, %v1644_v49  ;;  %v3248_v49 = vld [vmem:[%s4183_s9 + $0x6] ss:$0 sm:$0xff] }
 0x7a8   : > { %v1649_v53 = vmul.f32 %v1648_v51, %v1632_v22 }
 0x7aa   : > { %v1653_v54 = vmul.f32 %v3238_v50, %v1649_v53  ;;  %v3249_v50 = vld [vmem:[%s4183_s9 + $0x7] ss:$0 sm:$0xff] }
 0x7ac   : > { %v3874_v55 = vadd.f32 %v3239_v52, %v1653_v54 }
 0x7ae   : > { %v1658_v56 = vpack.c.bf16 %v3874_v55, %v3874_v55 }
 0x7b0   : > { %2898 = vmatmul.msk.bf16.vlgmr.msra.gmra.mxu2 %vm734_vm0, %v1658_v56  ;;  %2907 = vmatmul.msk.bf16.vlgmr.msra.gmra.mxu3 %vm734_vm0, %v1658_v56 }
 0x7b1   : > { %2916 = vmatmul.msk.bf16.vlgmr.msrb.gmra.mxu0 %vm734_vm0, %v1658_v56  ;;  %2925 = vmatmul.msk.bf16.vlgmr.msrb.gmra.mxu1 %vm734_vm0, %v1658_v56 }
 0x7b2   : > { %1982 = vmatpush.bf16.msra.mxu2 %v3159_v57  ;;  %2007 = vmatpush.bf16.msra.mxu3 %v3161_v58  ;;  %v3250_v58 = vld [vmem:[%s4183_s9 + $0x4] ss:$0 sm:$0xff] }
 0x7b3   : > { %2032 = vmatpush.bf16.msrb.mxu0 %v3163_v59  ;;  %2057 = vmatpush.bf16.msrb.mxu1 %v3165_v60  ;;  %v3251_v59 = vld [vmem:[%s4183_s9 + $0x5] ss:$0 sm:$0xff]  ;;  %s3329_s9 = scalar_lea.hbm %s4137_s22, 16 }
 0x7b4   : > { %p3331_p1 = scmp.lt.s32.totalorder %s3329_s9, %s3325_s6 }
 0x7b6   : > { %1983 = vmatpush.bf16.msra.mxu2 %v3158_v61  ;;  %2008 = vmatpush.bf16.msra.mxu3 %v3160_v62  ;;  %p3332_p2 = por %p3331_p1, %p3330_p0 }
 0x7b7   : > { %2033 = vmatpush.bf16.msrb.mxu0 %v3162_v63  ;;  %2058 = vmatpush.bf16.msrb.mxu1 %v3164_v0 }
 0x7b8   : > { %p3333_p3 = pnand %p3332_p2, %p3328_p13 }
 0x7c0   : > { %2954 = vmatmul.msk.bf16.vlgmr.msrb.gmra.mxu2 %vm734_vm0, %v1658_v56  ;;  %2963 = vmatmul.msk.bf16.vlgmr.msrb.gmra.mxu3 %vm734_vm0, %v1658_v56 }
 0x7c1   : > { %2972 = vmatmul.msk.bf16.vlgmr.msra.gmra.mxu0 %vm734_vm0, %v1658_v56  ;;  %2981 = vmatmul.msk.bf16.vlgmr.msra.gmra.mxu1 %vm734_vm0, %v1658_v56 }
 0x7d0   : > { %3010 = vmatmul.msk.bf16.vlgmr.msra.gmra.mxu2 %vm734_vm0, %v1658_v56  ;;  %3019 = vmatmul.msk.bf16.vlgmr.msra.gmra.mxu3 %vm734_vm0, %v1658_v56 }
 0x7d1   : > { %3028 = vmatmul.msk.bf16.vlgmr.msrb.gmra.mxu0 %vm734_vm0, %v1658_v56  ;;  %3037 = vmatmul.msk.bf16.vlgmr.msrb.gmra.mxu1 %vm734_vm0, %v1658_v56 }
 0x82e   : > { %v1767_v1 = vpop.f32.mrf.mxu0  ;;  %v1792_v2 = vpop.f32.mrf.mxu1 }
 0x82f   : > { %v1768_v21 = vadd.f32 %v3240_v13, %v1767_v1  ;;  %v1793_v22 = vadd.f32 %v3241_v14, %v1792_v2 }
 0x831   : > { %v2066_v33 = vmul.f32 0.35355338, %v1768_v21  ;;  %v2067_v34 = vmul.f32 0.35355338, %v1793_v22 }
 0x833   : > { %v1717_v4 = vpop.f32.mrf.mxu2  ;;  %v1742_v5 = vpop.f32.mrf.mxu3  ;;  %v2070_v42 = vpack.c.bf16 %v2066_v33, %v2066_v33  ;;  %v2071_v43 = vpack.c.bf16 %v2067_v34, %v2067_v34 }
 0x834   : > { %v1718_v35 = vadd.f32 %v3242_v25, %v1717_v4  ;;  %v1743_v36 = vadd.f32 %v3243_v26, %v1742_v5 }
 0x836   : > { %v1769_v6 = vpop.f32.mrf.mxu0  ;;  %v1794_v7 = vpop.f32.mrf.mxu1  ;;  %v2064_v45 = vmul.f32 0.35355338, %v1718_v35  ;;  %v2065_v46 = vmul.f32 0.35355338, %v1743_v36 }
 0x838   : > { %v2068_v51 = vpack.c.bf16 %v2064_v45, %v2064_v45  ;;  %v2069_v52 = vpack.c.bf16 %v2065_v46, %v2065_v46 }
 0x83b   : > { %v1719_v9 = vpop.f32.mrf.mxu2  ;;  %v1744_v10 = vpop.f32.mrf.mxu3 }
 0x83e   : > { %v1901_v15 = vpop.f32.mrf.mxu0  ;;  %v1926_v16 = vpop.f32.mrf.mxu1 }
 0x83f   : > { %v1902_v17 = vadd.f32 %v3244_v11, %v1901_v15  ;;  %v1927_v18 = vadd.f32 %v3245_v12, %v1926_v16 }
 0x841   : > { %v2074_v23 = vpack.c.bf16 %v1902_v17, %v1902_v17  ;;  %v2075_v24 = vpack.c.bf16 %v1927_v18, %v1927_v18 }
 0x843   : > { %v2118_v27 = vsel %vm1190_vm5, %v2074_v23, 0  ;;  %v2137_v28 = vsel %vm1190_vm5, %v2075_v24, 0  ;;  %v1851_v29 = vpop.f32.mrf.mxu2  ;;  %v1876_v30 = vpop.f32.mrf.mxu3 }
 0x844   : > { %v1852_v31 = vadd.f32 %v3246_v19, %v1851_v29  ;;  %v1877_v32 = vadd.f32 %v3247_v20, %v1876_v30  ;;  %2127 = vmatpush.bf16.xpose.msra.mxu0 %v2118_v27  ;;  %2146 = vmatpush.bf16.xpose.msra.mxu1 %v2137_v28 }
 0x846   : > { %v2072_v37 = vpack.c.bf16 %v1852_v31, %v1852_v31  ;;  %v2073_v38 = vpack.c.bf16 %v1877_v32, %v1877_v32  ;;  %v1903_v39 = vpop.f32.mrf.mxu0  ;;  %v1928_v40 = vpop.f32.mrf.mxu1 }
 0x848   : > { %v2080_v44 = vsel %vm1190_vm5, %v2072_v37, 0  ;;  %v2099_v41 = vsel %vm1190_vm5, %v2073_v38, 0 }
 0x849   : > { %2089 = vmatpush.bf16.xpose.msrb.mxu2 %v2080_v44  ;;  %2108 = vmatpush.bf16.xpose.msrb.mxu3 %v2099_v41 }
 0x84b   : > { %3040 = vmatmul.msk.bf16.vlgmr.msra.gmra.mxu0 %vm1190_vm5, %v2070_v42  ;;  %3041 = vmatmul.msk.bf16.vlgmr.msra.gmra.mxu1 %vm1190_vm5, %v2071_v43  ;;  %v1853_v47 = vpop.f32.mrf.mxu2  ;;  %v1878_v48 = vpop.f32.mrf.mxu3 }
 0x84e   : > { %v2035_v53 = vpop.f32.mrf.mxu0  ;;  %v2060_v54 = vpop.f32.mrf.mxu1 }
 0x84f   : > { %v2036_v56 = vadd.f32 %v3248_v49, %v2035_v53  ;;  %v2061_v57 = vadd.f32 %v3249_v50, %v2060_v54 }
 0x850   : > { %3038 = vmatmul.msk.bf16.vlgmr.msrb.gmra.mxu2 %vm1190_vm5, %v2068_v51  ;;  %3039 = vmatmul.msk.bf16.vlgmr.msrb.gmra.mxu3 %vm1190_vm5, %v2069_v52 }
 0x851   : > { %v2202_v60 = vpack.c.bf16 %v2036_v56, %v2036_v56  ;;  %v2203_v61 = vpack.c.bf16 %v2061_v57, %v2061_v57 }
 0x853   : > { %v2246_v62 = vsel %vm1322_vm6, %v2202_v60, 0  ;;  %v2265_v63 = vsel %vm1322_vm6, %v2203_v61, 0  ;;  %v1985_v0 = vpop.f32.mrf.mxu2  ;;  %v2010_v1 = vpop.f32.mrf.mxu3 }
 0x854   : > { %v1986_v2 = vadd.f32 %v3250_v58, %v1985_v0  ;;  %v2011_v4 = vadd.f32 %v3251_v59, %v2010_v1  ;;  %2255 = vmatpush.bf16.msrb.mxu0 %v2246_v62  ;;  %2274 = vmatpush.bf16.msrb.mxu1 %v2265_v63 }
 0x856   : > { %v2200_v5 = vpack.c.bf16 %v1986_v2, %v1986_v2  ;;  %v2201_v6 = vpack.c.bf16 %v2011_v4, %v2011_v4  ;;  %v2037_v7 = vpop.f32.mrf.mxu0  ;;  %v2062_v9 = vpop.f32.mrf.mxu1  ;;  %v3048_v2 = vld [vmem:[%s4185_s10 + $0x18] sm:$0xf] }
 0x857   : > { %v2331_v4 = vsel %vm1322_vm6, %v3048_v2, 0  ;;  %v3170_v2 = vld [vmem:[%s4131_s16 + $0x30] sm:$0xff] }
 0x858   : > { %v2208_v10 = vsel %vm1322_vm6, %v2200_v5, 0  ;;  %v2227_v11 = vsel %vm1322_vm6, %v2201_v6, 0  ;;  %2340 = vmatpush.bf16.msra.mxu0 %v2331_v4  ;;  %v3046_v5 = vld [vmem:[%s4185_s10 + $0x10] sm:$0xf]  ;;  %v3047_v6 = vld [vmem:[%s4185_s10 + $0x14] sm:$0xf] }
 0x859   : > { %2217 = vmatpush.bf16.msra.mxu2 %v2208_v10  ;;  %2236 = vmatpush.bf16.msra.mxu3 %v2227_v11  ;;  %v2293_v7 = vsel %vm1322_vm6, %v3046_v5, 0  ;;  %v2312_v9 = vsel %vm1322_vm6, %v3047_v6, 0  ;;  %v3049_v10 = vld [vmem:[%s4185_s10 + $0x1c] sm:$0xf]  ;;  %v3169_v4 = vld [vmem:[%s4131_s16 + $0x28] sm:$0xff]  ;;  %v3168_v5 = vld [vmem:[%s4131_s16 + $0x20] sm:$0xff] }
 0x85a   : > { %v2350_v11 = vsel %vm1322_vm6, %v3049_v10, 0  ;;  %v3255_v6 = vld [vmem:[%s4130_s15 + $0x1] ss:$0 sm:$0xff] }
 0x85b   : > { %v1987_v12 = vpop.f32.mrf.mxu2  ;;  %v2012_v13 = vpop.f32.mrf.mxu3  ;;  %2359 = vmatpush.bf16.msra.mxu1 %v2350_v11 }
 0x85d   : > { %2302 = vmatpush.bf16.msrb.mxu2 %v2293_v7  ;;  %2321 = vmatpush.bf16.msrb.mxu3 %v2312_v9 }
 0x8c8   : > { %v2129_v14 = vpop.f32.mrf.mxu0  ;;  %v2148_v15 = vpop.f32.mrf.mxu1 }
 0x8c9   : > { %v2130_v16 = vadd.f32 %v2129_v14, %v3734_v3  ;;  %v2149_v26 = vadd.f32 %v2148_v15, %v3734_v3 }
 0x8cb   : > { %v2158_v17 = vsel %vm1190_vm5, %v2130_v16, -inf  ;;  %v2161_v29 = vsel %vm1190_vm5, %v2149_v26, -inf }
 0x8cc   : > { %2159 = vmax.xlane.f32.xlu1 %v2158_v17 }
 0x8d0   : > { %v2131_v18 = vpop.f32.mrf.mxu0  ;;  %v2150_v19 = vpop.f32.mrf.mxu1 }
 0x8d3   : > { %v2091_v20 = vpop.f32.mrf.mxu2  ;;  %v2110_v21 = vpop.f32.mrf.mxu3 }
 0x8d4   : > { %v2092_v22 = vadd.f32 %v2091_v20, %v3734_v3  ;;  %v2111_v23 = vadd.f32 %v2110_v21, %v3734_v3 }
 0x8d6   : > { %v2155_v24 = vsel %vm1190_vm5, %v2111_v23, -inf  ;;  %v2152_v25 = vsel %vm1190_vm5, %v2092_v22, -inf }
 0x8d7   : > { %2156 = vmax.xlane.f32.xlu0 %v2155_v24  ;;  %2153 = vmax.xlane.f32.xlu2 %v2152_v25 }
 0x8db   : > { %v2093_v27 = vpop.f32.mrf.mxu2  ;;  %v2112_v28 = vpop.f32.mrf.mxu3 }
 0x8df   : > { %2162 = vmax.xlane.f32.xlu2 %v2161_v29 }
 0x93f   : > { %v2160_v30 = vpop.xlane.xlu1 %2159 }
 0x940   : > { %v2166_v31 = vsub.f32 %v2130_v16, %v2160_v30 }
 0x942   : > { %v2172_v32 = vmul.f32 1.442695, %v2166_v31 }
 0x944   : > { %3285 = vpow2.f32 %v2172_v32 }
 0x94a   : > { %v3286_v33 = vpop.eup %3285  ;;  %v2157_v34 = vpop.xlane.xlu0 %2156 }
 0x94b   : > { %v2154_v35 = vpop.xlane.xlu2 %2153  ;;  %v2165_v36 = vsub.f32 %v2111_v23, %v2157_v34  ;;  %v2182_v38 = vsel %vm1190_vm5, %v3286_v33, 0.0 }
 0x94c   : > { %v2164_v37 = vsub.f32 %v2092_v22, %v2154_v35  ;;  %2183 = vadd.xlane.f32.xlu2 %v2182_v38  ;;  %v3252_v35 = vld [vmem:[%s4186_s11 + $0x1] ss:$0 sm:$0xff] }
 0x94d   : > { %v2170_v39 = vmul.f32 1.442695, %v2165_v36 }
 0x94e   : > { %v2168_v40 = vmul.f32 1.442695, %v2164_v37 }
 0x94f   : > { %3287 = vpow2.f32 %v2170_v39 }
 0x950   : > { %3289 = vpow2.f32 %v2168_v40 }
 0x953   : > { %v2163_v3 = vpop.xlane.xlu2 %2162 }
 0x954   : > { %v2167_v44 = vsub.f32 %v2149_v26, %v2163_v3 }
 0x955   : > { %v3288_v41 = vpop.eup %3287 }
 0x956   : > { %v2174_v42 = vmul.f32 1.442695, %v2167_v44  ;;  %v3290_v43 = vpop.eup %3289  ;;  %v2179_v45 = vsel %vm1190_vm5, %v3288_v41, 0.0 }
 0x957   : > { %2180 = vadd.xlane.f32.xlu1 %v2179_v45  ;;  %v2176_v46 = vsel %vm1190_vm5, %v3290_v43, 0.0 }
 0x958   : > { %3291 = vpow2.f32 %v2174_v42  ;;  %2177 = vadd.xlane.f32.xlu0 %v2176_v46 }
 0x95e   : > { %v3292_v47 = vpop.eup %3291 }
 0x95f   : > { %v2185_v48 = vsel %vm1190_vm5, %v3292_v47, 0.0 }
 0x960   : > { %2186 = vadd.xlane.f32.xlu0 %v2185_v48 }
 0x9bf   : > { %v2184_v49 = vpop.xlane.xlu2 %2183 }
 0x9c0   : > { %3293 = vrcp.f32 %v2184_v49 }
 0x9c6   : > { %v3294_v50 = vpop.eup %3293 }
 0x9c7   : > { %v2194_v51 = vmul.f32 %v3294_v50, %v3286_v33 }
 0x9c9   : > { %v2198_v52 = vpack.c.bf16 %v2194_v51, %v2194_v51 }
 0x9ca   : > { %v2181_v53 = vpop.xlane.xlu1 %2180 }
 0x9cb   : > { %3295 = vrcp.f32 %v2181_v53  ;;  %v2178_v54 = vpop.xlane.xlu0 %2177  ;;  %3044 = vmatmul.msk.bf16.vlgmr.msrb.gmra.mxu0 %vm1190_vm5, %v2198_v52 }
 0x9cc   : > { %3297 = vrcp.f32 %v2178_v54 }
 0x9d1   : > { %v3296_v56 = vpop.eup %3295 }
 0x9d2   : > { %v3298_v57 = vpop.eup %3297  ;;  %v2193_v58 = vmul.f32 %v3296_v56, %v3288_v41 }
 0x9d3   : > { %v2192_v59 = vmul.f32 %v3298_v57, %v3290_v43  ;;  %v2187_v60 = vpop.xlane.xlu0 %2186 }
 0x9d4   : > { %v2197_v61 = vpack.c.bf16 %v2193_v58, %v2193_v58  ;;  %3299 = vrcp.f32 %v2187_v60  ;;  %v3253_v58 = vld [vmem:[%s4127_s12 + $0x1] ss:$0 sm:$0xff] }
 0x9d5   : > { %v2196_v62 = vpack.c.bf16 %v2192_v59, %v2192_v59  ;;  %v3254_v60 = vld [vmem:[%s4128_s13 + $0x1] ss:$0 sm:$0xff] }
 0x9d6   : > { %3043 = vmatmul.msk.bf16.vlgmr.msra.gmra.mxu3 %vm1190_vm5, %v2197_v61 }
 0x9d7   : > { %3042 = vmatmul.msk.bf16.vlgmr.msra.gmra.mxu2 %vm1190_vm5, %v2196_v62 }
 0x9da   : > { %v3300_v63 = vpop.eup %3299 }
 0x9db   : > { %v2195_v0 = vmul.f32 %v3300_v63, %v3292_v47  ;;  %v3167_v47 = vld [vmem:[%s4129_s14 + $0x18] sm:$0xff] }
 0x9dc   : > { %2445 = vmatpush.bf16.msra.mxu2 %v3167_v47 }
 0x9dd   : > { %v2199_v1 = vpack.c.bf16 %v2195_v0, %v2195_v0 }
 0x9df   : > { %3045 = vmatmul.msk.bf16.vlgmr.msrb.gmra.mxu1 %vm1190_vm5, %v2199_v1  ;;  %v3171_v1 = vld [vmem:[%s4131_s16 + $0x38] sm:$0xff] }
 0x9e0   : > { %2507 = vmatpush.bf16.msra.mxu3 %v3171_v1 }
 0x9e4   : > { %2508 = vmatpush.bf16.msra.mxu3 %v3170_v2 }
 0x9e8   : > { %2509 = vmatpush.bf16.msra.mxu3 %v3169_v4 }
 0x9ec   : > { %2510 = vmatpush.bf16.msra.mxu3 %v3168_v5 }
 0xa48   : > { %v2257_v12 = vpop.f32.mrf.mxu0 }
 0xa49   : > { %v2282_v13 = vpack.c.bf16 %v2257_v12, %v2257_v12 }
 0xa4b   : > { %3052 = vmatmul.msk.bf16.vlgmr.msra.gmra.mxu0 %vm1190_vm5, %v2282_v13 }
 0xa50   : > { %v2259_v14 = vpop.f32.mrf.mxu0 }
 0xa59   : > { %v2238_v15 = vpop.f32.mrf.mxu3 }
 0xa5a   : > { %v2219_v16 = vpop.f32.mrf.mxu2  ;;  %v2281_v17 = vpack.c.bf16 %v2238_v15, %v2238_v15 }
 0xa5b   : > { %v2280_v18 = vpack.c.bf16 %v2219_v16, %v2219_v16 }
 0xa5c   : > { %v2276_v19 = vpop.f32.mrf.mxu1  ;;  %3051 = vmatmul.msk.bf16.vlgmr.msrb.gmra.mxu3 %vm1190_vm5, %v2281_v17 }
 0xa5d   : > { %v2283_v20 = vpack.c.bf16 %v2276_v19, %v2276_v19  ;;  %3050 = vmatmul.msk.bf16.vlgmr.msrb.gmra.mxu2 %vm1190_vm5, %v2280_v18 }
 0xa5f   : > { %3053 = vmatmul.msk.bf16.vlgmr.msra.gmra.mxu1 %vm1190_vm5, %v2283_v20 }
 0xa61   : > { %v2240_v21 = vpop.f32.mrf.mxu3 }
 0xa62   : > { %v2221_v22 = vpop.f32.mrf.mxu2  ;;  %v3256_v21 = vld [vmem:[%s4132_s17 + $0x1] ss:$0 sm:$0xff] }
 0xa64   : > { %v2278_v23 = vpop.f32.mrf.mxu1 }
 0xac8   : > { %v2342_v24 = vpop.f32.mrf.mxu0 }
 0xac9   : > { %v2368_v32 = vsel %vm734_vm0, %v2342_v24, 0.0 }
 0xad0   : > { %v2344_v25 = vpop.f32.mrf.mxu0 }
 0xadc   : > { %v2361_v26 = vpop.f32.mrf.mxu1 }
 0xadd   : > { %v2370_v36 = vsel %vm734_vm0, %v2361_v26, 0.0 }
 0xadf   : > { %v2323_v27 = vpop.f32.mrf.mxu3 }
 0xae0   : > { %v2304_v28 = vpop.f32.mrf.mxu2  ;;  %v2366_v29 = vsel %vm734_vm0, %v2323_v27, 0.0 }
 0xae1   : > { %v2365_v30 = vsel %vm734_vm0, %v2304_v28, 0.0 }
 0xae2   : > { %v2367_v31 = vadd.f32 %v2366_v29, %v2365_v30 }
 0xae4   : > { %v2369_v33 = vadd.f32 %v2368_v32, %v2367_v31  ;;  %v2363_v34 = vpop.f32.mrf.mxu1  ;;  %v3173_v32 = vld [vmem:[%s4135_s20 + $0x8] sm:$0xff] }
 0xae5   : > { %2579 = vmatpush.bf16.msrb.mxu0 %v3173_v32 }
 0xae6   : > { %v2371_v37 = vadd.f32 %v2370_v36, %v2369_v33  ;;  %v3172_v33 = vld [vmem:[%s4135_s20] sm:$0xff] }
 0xae7   : > { %v2325_v38 = vpop.f32.mrf.mxu3 }
 0xae8   : > { %v2306_v39 = vpop.f32.mrf.mxu2  ;;  %v2377_v40 = vadd.f32 %v3252_v35, %v2371_v37 }
 0xae9   : > { %2580 = vmatpush.bf16.msrb.mxu0 %v3172_v33 }
 0xaea   : > { %v2378_v3 = vadd.f32 %v2377_v40, %v3874_v55  ;;  %v3166_v55 = vld [vmem:[%s4129_s14 + $0x10] sm:$0xff] }
 0xaeb   : > { %2446 = vmatpush.bf16.msra.mxu2 %v3166_v55 }
 0xaec   : > { %v2383_v44 = vsel %vm734_vm0, %v2378_v3, 0.0 }
 0xaed   : > { %2384 = vadd.xlane.f32.xlu1 %v2383_v44 }
 0xb60   : > { %v2385_v41 = vpop.xlane.xlu1 %2384 }
 0xb61   : > { %v2386_v42 = vmul.f32 %v2385_v41, %v3583_v8  ;;  %v3257_v41 = vld [vmem:[%s4133_s18 + $0x1] ss:$0 sm:$0xff] }
 0xb63   : > { %v2387_v43 = vsub.f32 %v2378_v3, %v2386_v42  ;;  %v3258_v42 = vld [vmem:[%s4134_s19 + $0x1] ss:$0 sm:$0xff] }
 0xb65   : > { %v2388_v45 = vmul.f32 %v2387_v43, %v2387_v43 }
 0xb67   : > { %v2389_v46 = vsel %vm734_vm0, %v2388_v45, 0.0 }
 0xb68   : > { %2390 = vadd.xlane.f32.xlu2 %v2389_v46 }
 0xbdb   : > { %v2391_v48 = vpop.xlane.xlu2 %2390 }
 0xbdc   : > { %v2392_v49 = vmul.f32 %v2391_v48, %v3583_v8 }
 0xbde   : > { %v2393_v50 = vadd.f32 1e-12, %v2392_v49 }
 0xbe0   : > { %3301 = vrsqrt.f32 %v2393_v50  ;;  %vm2400_vm15 = vweird.f32 %v2393_v50 }
 0xbe6   : > { %v3302_v51 = vpop.eup %3301 }
 0xbe7   : > { %v2395_v52 = vmul.f32 %v3302_v51, %v2393_v50  ;;  %vm2401_vm14 = vweird.f32 %v3302_v51 }
 0xbe8   : > { %vm2402_vm1 = vmor %vm2400_vm15, %vm2401_vm14 }
 0xbe9   : > { %v2396_v53 = vmul.f32 %v3302_v51, %v2395_v52 }
 0xbeb   : > { %v2397_v54 = vmul.f32 0.5, %v2396_v53 }
 0xbed   : > { %v2398_v56 = vsub.f32 1.5, %v2397_v54 }
 0xbef   : > { %v2399_v57 = vmul.f32 %v3302_v51, %v2398_v56 }
 0xbf1   : > { %v2403_v59 = vsel %vm2402_vm1, %v3302_v51, %v2399_v57 }
 0xbf2   : > { %v2404_v61 = vmul.f32 %v2403_v59, %v2387_v43 }
 0xbf4   : > { %v2408_v62 = vmul.f32 %v3253_v58, %v2404_v61 }
 0xbf6   : > { %v2412_v63 = vadd.f32 %v3254_v60, %v2408_v62 }
 0xbf8   : > { %v2413_v0 = vpack.c.bf16 %v2412_v63, %v2412_v63 }
 0xbfa   : > { %3070 = vmatmul.msk.bf16.vlgmr.msra.gmra.mxu2 %vm734_vm0, %v2413_v0 }
 0xc7d   : > { %v2448_v7 = vpop.f32.mrf.mxu2 }
 0xc7e   : > { %v2449_v9 = vadd.f32 %v3255_v6, %v2448_v7 }
 0xc80   : > { %v2453_v10 = vmul.f32 0.044715, %v2449_v9  ;;  %v2452_v17 = vmul.f32 0.5, %v2449_v9 }
 0xc82   : > { %v2454_v11 = vmul.f32 %v2453_v10, %v2449_v9 }
 0xc84   : > { %v2455_v12 = vmul.f32 %v2454_v11, %v2449_v9 }
 0xc85   : > { %v2450_v13 = vpop.f32.mrf.mxu2 }
 0xc86   : > { %v2456_v14 = vadd.f32 %v2455_v12, %v2449_v9 }
 0xc88   : > { %v2457_v15 = vmul.f32 0.7978846, %v2456_v14 }
 0xc8a   : > { %3303 = vtanh.f32 %v2457_v15 }
 0xc90   : > { %v3304_v16 = vpop.eup %3303 }
 0xc91   : > { %v2459_v18 = vadd.f32 1.0, %v3304_v16 }
 0xc93   : > { %v2460_v19 = vmul.f32 %v2459_v18, %v2452_v17 }
 0xc95   : > { %v2461_v20 = vpack.c.bf16 %v2460_v19, %v2460_v19 }
 0xc97   : > { %3096 = vmatmul.msk.bf16.vlgmr.msra.gmra.mxu3 %vm1608_vm10, %v2461_v20 }
 0xd1a   : > { %v2512_v22 = vpop.f32.mrf.mxu3 }
 0xd1b   : > { %v2513_v23 = vadd.f32 %v3256_v21, %v2512_v22 }
 0xd1d   : > { %v2516_v24 = vadd.f32 %v2513_v23, %v2412_v63 }
 0xd1f   : > { %v2521_v25 = vsel %vm734_vm0, %v2516_v24, 0.0 }
 0xd20   : > { %2522 = vadd.xlane.f32.xlu0 %v2521_v25 }
 0xd22   : > { %v2514_v26 = vpop.f32.mrf.mxu3 }
 0xd93   : > { %v2523_v27 = vpop.xlane.xlu0 %2522 }
 0xd94   : > { %v2524_v28 = vmul.f32 %v2523_v27, %v3583_v8 }
 0xd96   : > { %v2525_v29 = vsub.f32 %v2516_v24, %v2524_v28 }
 0xd98   : > { %v2526_v30 = vmul.f32 %v2525_v29, %v2525_v29 }
 0xd9a   : > { %v2527_v31 = vsel %vm734_vm0, %v2526_v30, 0.0 }
 0xd9b   : > { %2528 = vadd.xlane.f32.xlu1 %v2527_v31 }
 0xe0e   : > { %v2529_v34 = vpop.xlane.xlu1 %2528 }
 0xe0f   : > { %v2530_v35 = vmul.f32 %v2529_v34, %v3583_v8 }
 0xe11   : > { %v2531_v36 = vadd.f32 1e-12, %v2530_v35 }
 0xe13   : > { %3305 = vrsqrt.f32 %v2531_v36  ;;  %vm2538_vm3 = vweird.f32 %v2531_v36 }
 0xe19   : > { %v3306_v37 = vpop.eup %3305 }
 0xe1a   : > { %v2533_v38 = vmul.f32 %v3306_v37, %v2531_v36  ;;  %vm2539_vm2 = vweird.f32 %v3306_v37 }
 0xe1b   : > { %vm2540_vm4 = vmor %vm2538_vm3, %vm2539_vm2 }
 0xe1c   : > { %v2534_v39 = vmul.f32 %v3306_v37, %v2533_v38 }
 0xe1e   : > { %v2535_v40 = vmul.f32 0.5, %v2534_v39 }
 0xe20   : > { %v2536_v3 = vsub.f32 1.5, %v2535_v40 }
 0xe22   : > { %v2537_v44 = vmul.f32 %v3306_v37, %v2536_v3 }
 0xe24   : > { %v2541_v8 = vsel %vm2540_vm4, %v3306_v37, %v2537_v44 }
 0xe25   : > { %v2542_v43 = vmul.f32 %v2541_v8, %v2525_v29 }
 0xe27   : > { %v2546_v45 = vmul.f32 %v3257_v41, %v2542_v43 }
 0xe29   : > { %v2550_v46 = vadd.f32 %v3258_v42, %v2546_v45 }
 0xe2b   : > { %v2552_v47 = vpack.c.bf16 %v2550_v46, %v2550_v46  ;;  %2551 = vst.msk [vmem:[%s716_s25] sm:$0xff] %vm734_vm0, %v2550_v46 }
 0xe2d   : > { %3107 = vmatmul.msk.bf16.vlgmr.msrb.gmra.mxu0 %vm734_vm0, %v2552_v47 }
 0xe2e   : > { %3336 = shalt.err (!%p3333_p3)
}
 0xe2f   : > { %3174 = dma.vmem_to_hbm [thread:$0]  (%p3564_p5), %s2607_s24, 128, %s2609_s27, %s2590_s26   ;;  %vm2587_vm0 = vcmask 253952  }
 0xe30   : > { %s4187_s0 = sld [smem:[#allocation26_spill]]  ;;  %s722_s9 = scalar_lea.vmem [#allocation4], %s4053_s29 }
 0xe31   : > { %s4188_s10 = sld [smem:[#allocation27_spill]]  ;;  %s2619_s1 = sshll.u32 %s722_s9, 4  ;;  %s2620_s1 = int_to_ptr.vmem [resolvable:$true] %s2619_s1 }
 0xe32   : > { %s2595_s2 = scalar_lea.sflag [#allocation5], %s4053_s29 }
 0xe36   : > { %v2557_v55 = vld [vmem:[%s4187_s0] sm:$0x1] }
 0xe37   : > { %s2617_s11 = scalar_lea.hbm %s4188_s10, %s3547_s5  ;;  %s3357_s4 = scalar_lea.hbm %s4188_s10, 2 }
 0xe38   : > { %s2621_s6 = sshll.u32 %s2617_s11, 4  ;;  %s2622_s6 = int_to_ptr.hbm [resolvable:$true] %s2621_s6 }
 0xe39   : > { %s3351_s24 = sshra.s32 %s2622_s6, 4  ;;  %s3352_s24 = int_to_ptr.hbm [resolvable:$true] %s3351_s24 }
 0xe3a   : > { %s3353_s27 = scalar_lea.hbm %s3352_s24, 1  ;;  %p3358_p9 = scmp.lt.s32.totalorder %s3352_s24, %s4188_s10 }
 0xe3b   : > { %p3354_p4 = scmp.ne.s32.totalorder %s3352_s24, %s3353_s27  ;;  %p3359_p10 = scmp.lt.s32.totalorder %s3357_s4, %s3353_s27 }
 0xe3d   : > { %p3355_p7 = pnand %p3354_p4, %p3564_p5  ;;  %p3360_p11 = por %p3359_p10, %p3358_p9 }
 0xe3f   : > { %p3356_p8 = pneg %p3355_p7 }
 0xe41   : > { %p3361_p12 = pnand %p3360_p11, %p3356_p8 }
 0xeaa   : > { %v2582_v48 = vpop.f32.mrf.mxu0 }
 0xeab   : > { %v2583_v49 = vadd.f32 %v2582_v48, %v2557_v55 }
 0xead   : > { %3307 = vtanh.f32 %v2583_v49 }
 0xeb2   : > { %v2584_v50 = vpop.f32.mrf.mxu0 }
 0xeb3   : > { %v3308_v51 = vpop.eup %3307 }
 0xeb4   : > { %2588 = vst.msk [vmem:[%s722_s9] sm:$0x1] %vm2587_vm0, %v3308_v51 }
 0xeb5   : > { %3364 = shalt.err (!%p3361_p12)
}
 0xeb6   : > { %3175 = dma.vmem_to_hbm [thread:$0]  (%p3564_p5), %s2620_s1, 16, %s2622_s6, %s2595_s2  }
 0xeb7 PF: > { %s4189_s29 = sld [smem:[#allocation10_spill]] }
 0xeb8   : > { %s4190_s0 = sld [smem:[#allocation8_spill]] }
 0xebd   : > { %p3185_p13 = scmp.ge.s32.totalorder %s4189_s29, 2 }
 0xebe   : > { %s2633_s21 = sand.u32 1, %s4190_s0  }
 0xebf   : > { %p3179_p0 = pnand %p3185_p13, %p3568_p6  ;;  %s2634_s11 = scalar_lea.sflag [#allocation3], %s2633_s21 }
 0xec1   : > { %p3180_p1 = pneg %p3179_p0 }
 0xec3   : > { %3382 = dma.done.wait (%p3180_p1), %s2634_s11, 128  }
 0xec4   : > { %3384 = vsyncadd (%p3180_p1), %s2634_s11, 4294967168  ;;  %s2644_s9 = scalar_lea.sflag [#allocation5], %s2633_s21 }
 0xec5   : > { %3386 = dma.done.wait (%p3180_p1), %s2644_s9, 16  }
 0xec6   : > { %3388 = vsyncadd (%p3180_p1), %s2644_s9, 4294967280  ;;  %s4192_s25 = sld [smem:[#allocation11_spill]]  ;;  %s4195_s4 = smov %s3395_s30 }
 0xec7   : > { %s4193_s24 = sld [smem:[#allocation9_spill]] }
 0xec8   : > { %s4194_s7 = sld [smem:[#allocation12_spill]] }
 0xecc   : > { %p37_p5 = scmp.ge.s32.totalorder %s4192_s25, 4  }
 0xecd   : > { %s4196_s30 = smov %s4193_s24 }
 0xece   : > { %s4197_s24 = smov %s4194_s7  ;;  %39 = sbr.rel (!%p37_p5) target bundleno = 20 (0x14), region = 179 }
 0xed3   :  { %2649 = vsyncpa [#allocation3], 1 }
 0xed4   :  { %2651 = vsyncpa [#allocation3 + $0x1], 1 }
 0xed5   :  { %2652 = vsyncpa [#allocation5], 1 }
 0xed6   :  { %2654 = vsyncpa [#allocation5 + $0x1], 1 }

</bundles_post_ra>
